<compile_context>
chip_gen: v7x
topology: tpu7x:2x2x1
jax: 0.10.0
libtpu: 0.0.40
codegen_flags: <defaults>
</compile_context>

<pallas_src>
import functools

import jax
import jax.numpy as jnp
from jax.experimental import pallas as pl
from jax.experimental.pallas import tpu as pltpu


# ---------------------------------------------------------------------------
# Encoder kernel: PointNetfeat (trans=False, global_feat=True) + Linear+BN+ReLU
# ---------------------------------------------------------------------------
def _encoder_kernel(x_ref, w1_ref, b1_ref, w2_ref, b2_ref, w3_ref, b3_ref,
                    wfc_ref, bfc_ref, feat_ref, max_sc):
    j = pl.program_id(1)

    x = x_ref[0].astype(jnp.bfloat16)                                 # (tn, 3)
    h = jnp.dot(x, w1_ref[...], preferred_element_type=jnp.float32) + b1_ref[...]
    h = jnp.maximum(h, 0.0)                                           # (tn, 64)
    h = jnp.dot(h.astype(jnp.bfloat16), w2_ref[...],
                preferred_element_type=jnp.float32) + b2_ref[...]
    h = jnp.maximum(h, 0.0)                                           # (tn, 128)
    h = jnp.dot(h.astype(jnp.bfloat16), w3_ref[...],
                preferred_element_type=jnp.float32) + b3_ref[...]     # bn3, no relu

    m = jnp.max(h, axis=0, keepdims=True)                             # (1, 1024)

    @pl.when(j == 0)
    def _():
        max_sc[...] = jnp.full(max_sc.shape, -jnp.inf, max_sc.dtype)

    max_sc[...] = jnp.maximum(max_sc[...], m)

    @pl.when(j == pl.num_programs(1) - 1)
    def _():
        g = max_sc[...].astype(jnp.bfloat16)                          # (1, 1024)
        f = jnp.dot(g, wfc_ref[...],
                    preferred_element_type=jnp.float32) + bfc_ref[...]
        feat_ref[0] = jnp.maximum(f, 0.0)                             # (1, bneck)


def _point_tile(n, target=512):
    """Largest point tile <= target that divides n and is a multiple of 8."""
    if n <= target:
        return n
    t = (target // 8) * 8
    while t >= 8:
        if n % t == 0:
            return t
        t -= 8
    return n


def encode(x_pts, params):
    """x_pts: (B, 3, N) -> global feature after Linear+BN+ReLU, (B, 1, bneck)."""
    enc = params["enc"]
    B, _, N = x_pts.shape
    bneck = enc["wfc"].shape[1]
    x = jnp.transpose(x_pts, (0, 2, 1))                     # (B, N, 3)
    tn = _point_tile(N)
    n_tiles = N // tn

    def wspec(shape):
        return pl.BlockSpec(shape, lambda b, j: (0, 0))

    return pl.pallas_call(
        _encoder_kernel,
        out_shape=jax.ShapeDtypeStruct((B, 1, bneck), jnp.float32),
        grid=(B, n_tiles),
        in_specs=[
            pl.BlockSpec((1, tn, 3), lambda b, j: (b, j, 0)),
            wspec(enc["w1"].shape), wspec(enc["b1"].shape),
            wspec(enc["w2"].shape), wspec(enc["b2"].shape),
            wspec(enc["w3"].shape), wspec(enc["b3"].shape),
            wspec(enc["wfc"].shape), wspec(enc["bfc"].shape),
        ],
        out_specs=pl.BlockSpec((1, 1, bneck), lambda b, j: (b, 0, 0)),
        scratch_shapes=[pltpu.VMEM((1, enc["w3"].shape[1]), jnp.float32)],
        compiler_params=pltpu.CompilerParams(
            dimension_semantics=("parallel", "arbitrary")),
    )(x, enc["w1"], enc["b1"], enc["w2"], enc["b2"],
      enc["w3"], enc["b3"], enc["wfc"], enc["bfc"])


# ---------------------------------------------------------------------------
# Decoder kernel: one fused PointGenCon (4 layers) per grid step (= primitive)
# ---------------------------------------------------------------------------
def _decoder_kernel(dec_idx_ref, grid_ref, feat_ref,
                    w1g_ref, w1f_ref, b1_ref, w2_ref, b2_ref,
                    w3_ref, b3_ref, w4_ref, b4_ref, out_ref):
    del dec_idx_ref  # used only by the index maps
    B = grid_ref.shape[1]
    S = grid_ref.shape[2]
    c0 = b1_ref.shape[-1]

    feat = feat_ref[...].reshape(B, feat_ref.shape[-1]).astype(jnp.bfloat16)
    # conv1 (+bn1) split: [grid, feat] @ W1 == grid @ W1[:2] + feat @ W1[2:]
    featb = jnp.dot(feat, w1f_ref[0],
                    preferred_element_type=jnp.float32) + b1_ref[0]   # (B, c0)
    g = grid_ref[0]                                                   # (B, S, 2)
    w1g = w1g_ref[0]                                                  # (2, c0) f32
    h = g[:, :, 0:1] * w1g[0:1, :] + g[:, :, 1:2] * w1g[1:2, :]       # (B, S, c0)
    h = jnp.maximum(h + featb[:, None, :], 0.0)
    h = h.reshape(B * S, c0)

    h = jnp.dot(h.astype(jnp.bfloat16), w2_ref[0],
                preferred_element_type=jnp.float32) + b2_ref[0]
    h = jnp.maximum(h, 0.0)                                           # (B*S, c0//2)
    h = jnp.dot(h.astype(jnp.bfloat16), w3_ref[0],
                preferred_element_type=jnp.float32) + b3_ref[0]
    h = jnp.maximum(h, 0.0)                                           # (B*S, c0//4)
    h = jnp.dot(h.astype(jnp.bfloat16), w4_ref[0],
                preferred_element_type=jnp.float32) + b4_ref[0]
    out_ref[0] = jnp.tanh(h).reshape(B, S, 3)


def decode_all(feat, grids, dec_idx, params):
    """feat: (B,1,bneck); grids: (K,B,S,2); dec_idx: (K,) int32 -> (K,B,S,3)."""
    dec = params["dec"]
    K, B, S, _ = grids.shape

    def wmap(k, idx):
        return (idx[k], 0, 0)

    def wspec(arr):
        return pl.BlockSpec((1,) + arr.shape[1:], wmap)

    return pl.pallas_call(
        _decoder_kernel,
        out_shape=jax.ShapeDtypeStruct((K, B, S, 3), jnp.float32),
        grid_spec=pltpu.PrefetchScalarGridSpec(
            num_scalar_prefetch=1,
            grid=(K,),
            in_specs=[
                pl.BlockSpec((1, B, S, 2), lambda k, idx: (k, 0, 0, 0)),
                pl.BlockSpec(feat.shape, lambda k, idx: (0, 0, 0)),
                wspec(dec["w1g"]), wspec(dec["w1f"]), wspec(dec["b1"]),
                wspec(dec["w2"]), wspec(dec["b2"]),
                wspec(dec["w3"]), wspec(dec["b3"]),
                wspec(dec["w4"]), wspec(dec["b4"]),
            ],
            out_specs=pl.BlockSpec((1, B, S, 3), lambda k, idx: (k, 0, 0, 0)),
        ),
        compiler_params=pltpu.CompilerParams(
            dimension_semantics=("parallel",)),
    )(dec_idx, grids, feat,
      dec["w1g"], dec["w1f"], dec["b1"], dec["w2"], dec["b2"],
      dec["w3"], dec["b3"], dec["w4"], dec["b4"])


# ---------------------------------------------------------------------------
# Deterministic parameter construction (synthetic weights, eval-mode BN folded)
# ---------------------------------------------------------------------------
def _folded_layer(key, cin, cout, bn=True, wscale=0.1, eps=1e-5):
    kw, kb, k1, k2, k3 = jax.random.split(key, 5)
    w = jax.random.normal(kw, (cin, cout), jnp.float32) * wscale
    b = jax.random.normal(kb, (cout,), jnp.float32) * wscale
    if bn:
        gamma = 1.0 + 0.1 * jax.random.normal(k1, (cout,), jnp.float32)
        beta = 0.1 * jax.random.normal(k2, (cout,), jnp.float32)
        mean = 0.1 * jax.random.normal(k3, (cout,), jnp.float32)
        var = jnp.ones((cout,), jnp.float32)
        scale = gamma * jax.lax.rsqrt(var + eps)
        w = w * scale[None, :]                 # fold BN scale into the weight
        shift = (b - mean) * scale + beta
    else:
        shift = b
    return w, shift.reshape(1, cout)


def init_params(key, cfg):
    bneck = cfg["bottleneck_size"]
    c0 = 2 + bneck
    c1, c2 = c0 // 2, c0 // 4
    n_dec = cfg["nb_primitives_line"] + cfg["nb_primitives_square"]
    keys = iter(jax.random.split(key, 4 + 4 * n_dec))

    enc = {}
    for name, cin, cout in (("1", 3, 64), ("2", 64, 128), ("3", 128, 1024),
                            ("fc", 1024, bneck)):
        w, s = _folded_layer(next(keys), cin, cout)
        enc["w" + name] = w.astype(jnp.bfloat16)      # MXU operand
        enc["b" + name] = s                           # f32 shift

    stacks = {k: [] for k in ("w1g", "w1f", "b1", "w2", "b2",
                              "w3", "b3", "w4", "b4")}
    for _ in range(n_dec):
        w, s = _folded_layer(next(keys), c0, c0)
        stacks["w1g"].append(w[:2])                        # grid part (VPU, f32)
        stacks["w1f"].append(w[2:].astype(jnp.bfloat16))   # feature part (MXU)
        stacks["b1"].append(s)
        w, s = _folded_layer(next(keys), c0, c1)
        stacks["w2"].append(w.astype(jnp.bfloat16)); stacks["b2"].append(s)
        w, s = _folded_layer(next(keys), c1, c2)
        stacks["w3"].append(w.astype(jnp.bfloat16)); stacks["b3"].append(s)
        w, s = _folded_layer(next(keys), c2, 3, bn=False)  # conv4 + tanh, no BN
        stacks["w4"].append(w.astype(jnp.bfloat16)); stacks["b4"].append(s)
    dec = {k: jnp.stack(v) for k, v in stacks.items()}
    return {"enc": enc, "dec": dec}


# ---------------------------------------------------------------------------
# Model forward
# ---------------------------------------------------------------------------
def ae_atlasnet_skeleton_forward(x_pts, params, rng_key, cfg):
    """x_pts: (B, 3, N) point cloud (PyTorch Conv1d layout).
    Returns (B, num_square_points + num_line_points, 3)."""
    B = x_pts.shape[0]
    nb_sq = cfg["nb_primitives_square"]
    nb_ln = cfg["nb_primitives_line"]
    S_sq = cfg["num_square_points"] // nb_sq
    S_ln = cfg["num_line_points"] // nb_ln
    S = max(S_sq, S_ln)
    K = nb_sq + nb_ln

    feat = encode(x_pts, params)                            # (B, 1, bneck)

    keys = jax.random.split(rng_key, K)
    grids = []
    for i in range(nb_sq):        # square primitives: rand_grid ~ U(0,1)^2
        grids.append(jax.random.uniform(keys[i], (B, S, 2), jnp.float32))
    for i in range(nb_ln):        # line primitives: [U(0,1); 0]
        u = jax.random.uniform(keys[nb_sq + i], (B, S, 1), jnp.float32)
        grids.append(jnp.concatenate([u, jnp.zeros((B, S, 1), jnp.float32)], -1))
    grids = jnp.stack(grids, axis=0)                        # (K, B, S, 2)

    # decoder[i] is reused for line primitive i — quirk of the original forward
    dec_idx = jnp.asarray(list(range(nb_sq)) + list(range(nb_ln)), jnp.int32)

    out = decode_all(feat, grids, dec_idx, params)          # (K, B, S, 3)

    # torch.cat(outs, 2).transpose(2, 1) -> (B, total_points, 3)
    if S_sq == S_ln:
        return jnp.transpose(out, (1, 0, 2, 3)).reshape(B, K * S, 3)
    parts = [out[k, :, :(S_sq if k < nb_sq else S_ln), :] for k in range(K)]
    return jnp.concatenate(parts, axis=1)


# ---------------------------------------------------------------------------
if __name__ == "__main__":
    cfg = dict(
        num_points=64,
        num_line_points=64,
        num_square_points=64,
        bottleneck_size=32,
        nb_primitives_line=2,
        nb_primitives_square=2,
    )
    B, N = 2, cfg["num_points"]

    key = jax.random.PRNGKey(0)
    k_x, k_p, k_g = jax.random.split(key, 3)

    x = jax.random.normal(k_x, (B, 3, N), jnp.float32)   # (B, 3, N) point cloud
    params = init_params(k_p, cfg)

    fwd = jax.jit(functools.partial(ae_atlasnet_skeleton_forward, cfg=cfg))
    out = jax.block_until_ready(fwd(x, params, k_g))

    expected = (B, cfg["num_square_points"] + cfg["num_line_points"], 3)
    assert out.shape == expected, (out.shape, expected)
    assert bool(jnp.all(jnp.isfinite(out)))
    assert bool(jnp.all(jnp.abs(out) <= 1.0 + 1e-6))     # tanh output range
    print("KERNEL_OK")
</pallas_src>

<mosaic_0001>
module attributes {stable_mosaic.version = 11 : i64} {
  func.func @_encoder_kernel(%arg0: i32, %arg1: i32, %arg2: memref<1x64x3xf32, #tpu.memory_space<vmem>>, %arg3: memref<3x64xbf16, #tpu.memory_space<vmem>>, %arg4: memref<1x64xf32, #tpu.memory_space<vmem>>, %arg5: memref<64x128xbf16, #tpu.memory_space<vmem>>, %arg6: memref<1x128xf32, #tpu.memory_space<vmem>>, %arg7: memref<128x1024xbf16, #tpu.memory_space<vmem>>, %arg8: memref<1x1024xf32, #tpu.memory_space<vmem>>, %arg9: memref<1024x32xbf16, #tpu.memory_space<vmem>>, %arg10: memref<1x32xf32, #tpu.memory_space<vmem>>, %arg11: memref<1x1x32xf32, #tpu.memory_space<vmem>>, %arg12: memref<1x1024xf32, #tpu.memory_space<vmem>>) attributes {dimension_semantics = [#tpu.dimension_semantics<parallel>, #tpu.dimension_semantics<arbitrary>], iteration_bounds = array<i64: 2, 1>, scalar_prefetch = 0 : i64, scratch_operands = 1 : i64, tpu.core_type = #tpu.core_type<tc>, window_params = [{transform_indices = @transform_0, window_bounds = array<i64: 1, 64, 3>}, {pipeline_mode = #tpu.pipeline_mode<synchronous>, transform_indices = @transform_1, window_bounds = array<i64: 3, 64>}, {pipeline_mode = #tpu.pipeline_mode<synchronous>, transform_indices = @transform_2, window_bounds = array<i64: 1, 64>}, {pipeline_mode = #tpu.pipeline_mode<synchronous>, transform_indices = @transform_3, window_bounds = array<i64: 64, 128>}, {pipeline_mode = #tpu.pipeline_mode<synchronous>, transform_indices = @transform_4, window_bounds = array<i64: 1, 128>}, {pipeline_mode = #tpu.pipeline_mode<synchronous>, transform_indices = @transform_5, window_bounds = array<i64: 128, 1024>}, {pipeline_mode = #tpu.pipeline_mode<synchronous>, transform_indices = @transform_6, window_bounds = array<i64: 1, 1024>}, {pipeline_mode = #tpu.pipeline_mode<synchronous>, transform_indices = @transform_7, window_bounds = array<i64: 1024, 32>}, {pipeline_mode = #tpu.pipeline_mode<synchronous>, transform_indices = @transform_8, window_bounds = array<i64: 1, 32>}, {transform_indices = @transform_9, window_bounds = array<i64: 1, 1, 32>}]} {
    %c0 = arith.constant 0 : index
    %c0_0 = arith.constant 0 : index
    %c0_1 = arith.constant 0 : index
    %0 = vector.load %arg2[%c0, %c0_0, %c0_1] : memref<1x64x3xf32, #tpu.memory_space<vmem>>, vector<1x64x3xf32>
    %1 = vector.shape_cast %0 : vector<1x64x3xf32> to vector<64x3xf32>
    %2 = arith.truncf %1 : vector<64x3xf32> to vector<64x3xbf16>
    %c0_2 = arith.constant 0 : index
    %c0_3 = arith.constant 0 : index
    %3 = vector.load %arg3[%c0_2, %c0_3] : memref<3x64xbf16, #tpu.memory_space<vmem>>, vector<3x64xbf16>
    %cst = arith.constant dense<0.000000e+00> : vector<64x64xf32>
    %4 = tpu.matmul %2, %3, %cst {dimension_numbers = #tpu.dot_dimension_numbers<[1], [0], [0], [1], [0, 0, 1, 1], [], []>} : vector<64x3xbf16>, vector<3x64xbf16>, vector<64x64xf32> -> vector<64x64xf32>
    %c0_4 = arith.constant 0 : index
    %c0_5 = arith.constant 0 : index
    %5 = vector.load %arg4[%c0_4, %c0_5] : memref<1x64xf32, #tpu.memory_space<vmem>>, vector<1x64xf32>
    %6 = vector.broadcast %5 : vector<1x64xf32> to vector<64x64xf32>
    %7 = arith.addf %4, %6 : vector<64x64xf32>
    %cst_6 = arith.constant 0.000000e+00 : f32
    %8 = vector.broadcast %cst_6 : f32 to vector<64x64xf32>
    %9 = arith.maximumf %7, %8 : vector<64x64xf32>
    %10 = arith.truncf %9 : vector<64x64xf32> to vector<64x64xbf16>
    %c0_7 = arith.constant 0 : index
    %c0_8 = arith.constant 0 : index
    %11 = vector.load %arg5[%c0_7, %c0_8] : memref<64x128xbf16, #tpu.memory_space<vmem>>, vector<64x128xbf16>
    %cst_9 = arith.constant dense<0.000000e+00> : vector<64x128xf32>
    %12 = tpu.matmul %10, %11, %cst_9 {dimension_numbers = #tpu.dot_dimension_numbers<[1], [0], [0], [1], [0, 0, 1, 1], [], []>} : vector<64x64xbf16>, vector<64x128xbf16>, vector<64x128xf32> -> vector<64x128xf32>
    %c0_10 = arith.constant 0 : index
    %c0_11 = arith.constant 0 : index
    %13 = vector.load %arg6[%c0_10, %c0_11] : memref<1x128xf32, #tpu.memory_space<vmem>>, vector<1x128xf32>
    %14 = vector.broadcast %13 : vector<1x128xf32> to vector<64x128xf32>
    %15 = arith.addf %12, %14 : vector<64x128xf32>
    %cst_12 = arith.constant 0.000000e+00 : f32
    %16 = vector.broadcast %cst_12 : f32 to vector<64x128xf32>
    %17 = arith.maximumf %15, %16 : vector<64x128xf32>
    %18 = arith.truncf %17 : vector<64x128xf32> to vector<64x128xbf16>
    %c0_13 = arith.constant 0 : index
    %c0_14 = arith.constant 0 : index
    %19 = vector.load %arg7[%c0_13, %c0_14] : memref<128x1024xbf16, #tpu.memory_space<vmem>>, vector<128x1024xbf16>
    %cst_15 = arith.constant dense<0.000000e+00> : vector<64x1024xf32>
    %20 = tpu.matmul %18, %19, %cst_15 {dimension_numbers = #tpu.dot_dimension_numbers<[1], [0], [0], [1], [0, 0, 1, 1], [], []>} : vector<64x128xbf16>, vector<128x1024xbf16>, vector<64x1024xf32> -> vector<64x1024xf32>
    %c0_16 = arith.constant 0 : index
    %c0_17 = arith.constant 0 : index
    %21 = vector.load %arg8[%c0_16, %c0_17] : memref<1x1024xf32, #tpu.memory_space<vmem>>, vector<1x1024xf32>
    %22 = vector.broadcast %21 : vector<1x1024xf32> to vector<64x1024xf32>
    %23 = arith.addf %20, %22 : vector<64x1024xf32>
    %cst_18 = arith.constant dense<0xFF800000> : vector<1024xf32>
    %24 = vector.multi_reduction <maximumf>, %23, %cst_18 [0] : vector<64x1024xf32> to vector<1024xf32>
    %25 = vector.shape_cast %24 : vector<1024xf32> to vector<1x1024xf32>
    %c0_i32 = arith.constant 0 : i32
    %26 = arith.cmpi eq, %arg1, %c0_i32 : i32
    %27 = arith.extui %26 : i1 to i32
    %c0_i32_19 = arith.constant 0 : i32
    %28 = arith.cmpi ne, %27, %c0_i32_19 : i32
    scf.if %28 {
      %cst_26 = arith.constant 0xFF800000 : f32
      %35 = vector.broadcast %cst_26 : f32 to vector<1x1024xf32>
      %c0_27 = arith.constant 0 : index
      %c0_28 = arith.constant 0 : index
      %36 = vector.load %arg12[%c0_27, %c0_28] : memref<1x1024xf32, #tpu.memory_space<vmem>>, vector<1x1024xf32>
      tpu.vector_store %arg12[%c0_27, %c0_28], %35 {strides = array<i32>} : memref<1x1024xf32, #tpu.memory_space<vmem>>, vector<1x1024xf32>,
    } else {
    }
    %c0_20 = arith.constant 0 : index
    %c0_21 = arith.constant 0 : index
    %29 = vector.load %arg12[%c0_20, %c0_21] : memref<1x1024xf32, #tpu.memory_space<vmem>>, vector<1x1024xf32>
    %30 = arith.maximumf %29, %25 : vector<1x1024xf32>
    %c0_22 = arith.constant 0 : index
    %c0_23 = arith.constant 0 : index
    %31 = vector.load %arg12[%c0_22, %c0_23] : memref<1x1024xf32, #tpu.memory_space<vmem>>, vector<1x1024xf32>
    tpu.vector_store %arg12[%c0_22, %c0_23], %30 {strides = array<i32>} : memref<1x1024xf32, #tpu.memory_space<vmem>>, vector<1x1024xf32>,
    %c0_i32_24 = arith.constant 0 : i32
    %32 = arith.cmpi eq, %arg1, %c0_i32_24 : i32
    %33 = arith.extui %32 : i1 to i32
    %c0_i32_25 = arith.constant 0 : i32
    %34 = arith.cmpi ne, %33, %c0_i32_25 : i32
    scf.if %34 {
      %c0_26 = arith.constant 0 : index
      %c0_27 = arith.constant 0 : index
      %35 = vector.load %arg12[%c0_26, %c0_27] : memref<1x1024xf32, #tpu.memory_space<vmem>>, vector<1x1024xf32>
      %36 = arith.truncf %35 : vector<1x1024xf32> to vector<1x1024xbf16>
      %c0_28 = arith.constant 0 : index
      %c0_29 = arith.constant 0 : index
      %37 = vector.load %arg9[%c0_28, %c0_29] : memref<1024x32xbf16, #tpu.memory_space<vmem>>, vector<1024x32xbf16>
      %cst_30 = arith.constant dense<0.000000e+00> : vector<1x32xf32>
      %38 = tpu.matmul %36, %37, %cst_30 {dimension_numbers = #tpu.dot_dimension_numbers<[1], [0], [0], [1], [0, 0, 1, 1], [], []>} : vector<1x1024xbf16>, vector<1024x32xbf16>, vector<1x32xf32> -> vector<1x32xf32>
      %c0_31 = arith.constant 0 : index
      %c0_32 = arith.constant 0 : index
      %39 = vector.load %arg10[%c0_31, %c0_32] : memref<1x32xf32, #tpu.memory_space<vmem>>, vector<1x32xf32>
      %40 = arith.addf %38, %39 : vector<1x32xf32>
      %cst_33 = arith.constant 0.000000e+00 : f32
      %41 = vector.broadcast %cst_33 : f32 to vector<1x32xf32>
      %42 = arith.maximumf %40, %41 : vector<1x32xf32>
      %c0_34 = arith.constant 0 : index
      %c0_35 = arith.constant 0 : index
      %c0_36 = arith.constant 0 : index
      %43 = vector.load %arg11[%c0_34, %c0_35, %c0_36] : memref<1x1x32xf32, #tpu.memory_space<vmem>>, vector<1x1x32xf32>
      %44 = vector.shape_cast %43 : vector<1x1x32xf32> to vector<1x32xf32>
      %45 = vector.shape_cast %42 : vector<1x32xf32> to vector<1x1x32xf32>
      tpu.vector_store %arg11[%c0_34, %c0_35, %c0_36], %45 {strides = array<i32>} : memref<1x1x32xf32, #tpu.memory_space<vmem>>, vector<1x1x32xf32>,
    } else {
    }
    return
  }
  func.func @transform_0(%arg0: i32, %arg1: i32) -> (i32, i32, i32) {
    %c0_i32 = arith.constant 0 : i32
    %c0_i32_0 = arith.constant 0 : i32
    return %arg0, %arg1, %c0_i32 : i32, i32, i32
  }
  func.func @transform_1(%arg0: i32, %arg1: i32) -> (i32, i32) {
    %c0_i32 = arith.constant 0 : i32
    %c0_i32_0 = arith.constant 0 : i32
    %c0_i32_1 = arith.constant 0 : i32
    return %c0_i32, %c0_i32_0 : i32, i32
  }
  func.func @transform_2(%arg0: i32, %arg1: i32) -> (i32, i32) {
    %c0_i32 = arith.constant 0 : i32
    %c0_i32_0 = arith.constant 0 : i32
    %c0_i32_1 = arith.constant 0 : i32
    return %c0_i32, %c0_i32_0 : i32, i32
  }
  func.func @transform_3(%arg0: i32, %arg1: i32) -> (i32, i32) {
    %c0_i32 = arith.constant 0 : i32
    %c0_i32_0 = arith.constant 0 : i32
    %c0_i32_1 = arith.constant 0 : i32
    return %c0_i32, %c0_i32_0 : i32, i32
  }
  func.func @transform_4(%arg0: i32, %arg1: i32) -> (i32, i32) {
    %c0_i32 = arith.constant 0 : i32
    %c0_i32_0 = arith.constant 0 : i32
    %c0_i32_1 = arith.constant 0 : i32
    return %c0_i32, %c0_i32_0 : i32, i32
  }
  func.func @transform_5(%arg0: i32, %arg1: i32) -> (i32, i32) {
    %c0_i32 = arith.constant 0 : i32
    %c0_i32_0 = arith.constant 0 : i32
    %c0_i32_1 = arith.constant 0 : i32
    return %c0_i32, %c0_i32_0 : i32, i32
  }
  func.func @transform_6(%arg0: i32, %arg1: i32) -> (i32, i32) {
    %c0_i32 = arith.constant 0 : i32
    %c0_i32_0 = arith.constant 0 : i32
    %c0_i32_1 = arith.constant 0 : i32
    return %c0_i32, %c0_i32_0 : i32, i32
  }
  func.func @transform_7(%arg0: i32, %arg1: i32) -> (i32, i32) {
    %c0_i32 = arith.constant 0 : i32
    %c0_i32_0 = arith.constant 0 : i32
    %c0_i32_1 = arith.constant 0 : i32
    return %c0_i32, %c0_i32_0 : i32, i32
  }
  func.func @transform_8(%arg0: i32, %arg1: i32) -> (i32, i32) {
    %c0_i32 = arith.constant 0 : i32
    %c0_i32_0 = arith.constant 0 : i32
    %c0_i32_1 = arith.constant 0 : i32
    return %c0_i32, %c0_i32_0 : i32, i32
  }
  func.func @transform_9(%arg0: i32, %arg1: i32) -> (i32, i32, i32) {
    %c0_i32 = arith.constant 0 : i32
    %c0_i32_0 = arith.constant 0 : i32
    %c0_i32_1 = arith.constant 0 : i32
    return %arg0, %c0_i32, %c0_i32_0 : i32, i32, i32
  }
}

module attributes {stable_mosaic.version = 11 : i64} {
  func.func @_decoder_kernel(%arg0: i32, %arg1: memref<4xi32, #tpu.memory_space<smem>>, %arg2: memref<1x2x32x2xf32, #tpu.memory_space<vmem>>, %arg3: memref<2x1x32xf32, #tpu.memory_space<vmem>>, %arg4: memref<1x2x34xf32, #tpu.memory_space<vmem>>, %arg5: memref<1x32x34xbf16, #tpu.memory_space<vmem>>, %arg6: memref<1x1x34xf32, #tpu.memory_space<vmem>>, %arg7: memref<1x34x17xbf16, #tpu.memory_space<vmem>>, %arg8: memref<1x1x17xf32, #tpu.memory_space<vmem>>, %arg9: memref<1x17x8xbf16, #tpu.memory_space<vmem>>, %arg10: memref<1x1x8xf32, #tpu.memory_space<vmem>>, %arg11: memref<1x8x3xbf16, #tpu.memory_space<vmem>>, %arg12: memref<1x1x3xf32, #tpu.memory_space<vmem>>, %arg13: memref<1x2x32x3xf32, #tpu.memory_space<vmem>>) attributes {dimension_semantics = [#tpu.dimension_semantics<parallel>], iteration_bounds = array<i64: 4>, scalar_prefetch = 1 : i64, scratch_operands = 0 : i64, tpu.core_type = #tpu.core_type<tc>, window_params = [{transform_indices = @transform_0, window_bounds = array<i64: 1, 2, 32, 2>}, {pipeline_mode = #tpu.pipeline_mode<synchronous>, transform_indices = @transform_1, window_bounds = array<i64: 2, 1, 32>}, {transform_indices = @transform_2, window_bounds = array<i64: 1, 2, 34>}, {transform_indices = @transform_3, window_bounds = array<i64: 1, 32, 34>}, {transform_indices = @transform_4, window_bounds = array<i64: 1, 1, 34>}, {transform_indices = @transform_5, window_bounds = array<i64: 1, 34, 17>}, {transform_indices = @transform_6, window_bounds = array<i64: 1, 1, 17>}, {transform_indices = @transform_7, window_bounds = array<i64: 1, 17, 8>}, {transform_indices = @transform_8, window_bounds = array<i64: 1, 1, 8>}, {transform_indices = @transform_9, window_bounds = array<i64: 1, 8, 3>}, {transform_indices = @transform_10, window_bounds = array<i64: 1, 1, 3>}, {transform_indices = @transform_11, window_bounds = array<i64: 1, 2, 32, 3>}]} {
    %c0 = arith.constant 0 : index
    %c0_0 = arith.constant 0 : index
    %c0_1 = arith.constant 0 : index
    %0 = vector.load %arg3[%c0, %c0_0, %c0_1] : memref<2x1x32xf32, #tpu.memory_space<vmem>>, vector<2x1x32xf32>
    %1 = vector.shape_cast %0 : vector<2x1x32xf32> to vector<2x32xf32>
    %2 = arith.truncf %1 : vector<2x32xf32> to vector<2x32xbf16>
    %c0_2 = arith.constant 0 : index
    %c0_3 = arith.constant 0 : index
    %c0_4 = arith.constant 0 : index
    %3 = vector.load %arg5[%c0_2, %c0_3, %c0_4] : memref<1x32x34xbf16, #tpu.memory_space<vmem>>, vector<1x32x34xbf16>
    %4 = vector.shape_cast %3 : vector<1x32x34xbf16> to vector<32x34xbf16>
    %cst = arith.constant dense<0.000000e+00> : vector<2x34xf32>
    %5 = tpu.matmul %2, %4, %cst {dimension_numbers = #tpu.dot_dimension_numbers<[1], [0], [0], [1], [0, 0, 1, 1], [], []>} : vector<2x32xbf16>, vector<32x34xbf16>, vector<2x34xf32> -> vector<2x34xf32>
    %c0_5 = arith.constant 0 : index
    %c0_6 = arith.constant 0 : index
    %c0_7 = arith.constant 0 : index
    %6 = vector.load %arg6[%c0_5, %c0_6, %c0_7] : memref<1x1x34xf32, #tpu.memory_space<vmem>>, vector<1x1x34xf32>
    %7 = vector.shape_cast %6 : vector<1x1x34xf32> to vector<1x34xf32>
    %8 = vector.broadcast %7 : vector<1x34xf32> to vector<2x34xf32>
    %9 = arith.addf %5, %8 : vector<2x34xf32>
    %c0_8 = arith.constant 0 : index
    %c0_9 = arith.constant 0 : index
    %c0_10 = arith.constant 0 : index
    %c0_11 = arith.constant 0 : index
    %10 = vector.load %arg2[%c0_8, %c0_9, %c0_10, %c0_11] : memref<1x2x32x2xf32, #tpu.memory_space<vmem>>, vector<1x2x32x2xf32>
    %11 = vector.shape_cast %10 : vector<1x2x32x2xf32> to vector<2x32x2xf32>
    %c0_12 = arith.constant 0 : index
    %c0_13 = arith.constant 0 : index
    %c0_14 = arith.constant 0 : index
    %12 = vector.load %arg4[%c0_12, %c0_13, %c0_14] : memref<1x2x34xf32, #tpu.memory_space<vmem>>, vector<1x2x34xf32>
    %13 = vector.shape_cast %12 : vector<1x2x34xf32> to vector<2x34xf32>
    %14 = vector.extract_strided_slice %11 {offsets = [0, 0, 0], sizes = [2, 32, 1], strides = [1, 1, 1]} : vector<2x32x2xf32> to vector<2x32x1xf32>
    %15 = vector.extract_strided_slice %13 {offsets = [0, 0], sizes = [1, 34], strides = [1, 1]} : vector<2x34xf32> to vector<1x34xf32>
    %16 = vector.shape_cast %15 : vector<1x34xf32> to vector<1x1x34xf32>
    %17 = vector.broadcast %14 : vector<2x32x1xf32> to vector<2x32x34xf32>
    %18 = vector.broadcast %16 : vector<1x1x34xf32> to vector<2x32x34xf32>
    %19 = arith.mulf %17, %18 : vector<2x32x34xf32>
    %20 = vector.extract_strided_slice %11 {offsets = [0, 0, 1], sizes = [2, 32, 1], strides = [1, 1, 1]} : vector<2x32x2xf32> to vector<2x32x1xf32>
    %21 = vector.extract_strided_slice %13 {offsets = [1, 0], sizes = [1, 34], strides = [1, 1]} : vector<2x34xf32> to vector<1x34xf32>
    %22 = vector.shape_cast %21 : vector<1x34xf32> to vector<1x1x34xf32>
    %23 = vector.broadcast %20 : vector<2x32x1xf32> to vector<2x32x34xf32>
    %24 = vector.broadcast %22 : vector<1x1x34xf32> to vector<2x32x34xf32>
    %25 = arith.mulf %23, %24 : vector<2x32x34xf32>
    %26 = arith.addf %19, %25 : vector<2x32x34xf32>
    %27 = vector.shape_cast %9 : vector<2x34xf32> to vector<2x1x34xf32>
    %28 = vector.broadcast %27 : vector<2x1x34xf32> to vector<2x32x34xf32>
    %29 = arith.addf %26, %28 : vector<2x32x34xf32>
    %cst_15 = arith.constant 0.000000e+00 : f32
    %30 = vector.broadcast %cst_15 : f32 to vector<2x32x34xf32>
    %31 = arith.maximumf %29, %30 : vector<2x32x34xf32>
    %32 = vector.shape_cast %31 : vector<2x32x34xf32> to vector<64x34xf32>
    %33 = arith.truncf %32 : vector<64x34xf32> to vector<64x34xbf16>
    %c0_16 = arith.constant 0 : index
    %c0_17 = arith.constant 0 : index
    %c0_18 = arith.constant 0 : index
    %34 = vector.load %arg7[%c0_16, %c0_17, %c0_18] : memref<1x34x17xbf16, #tpu.memory_space<vmem>>, vector<1x34x17xbf16>
    %35 = vector.shape_cast %34 : vector<1x34x17xbf16> to vector<34x17xbf16>
    %cst_19 = arith.constant dense<0.000000e+00> : vector<64x17xf32>
    %36 = tpu.matmul %33, %35, %cst_19 {dimension_numbers = #tpu.dot_dimension_numbers<[1], [0], [0], [1], [0, 0, 1, 1], [], []>} : vector<64x34xbf16>, vector<34x17xbf16>, vector<64x17xf32> -> vector<64x17xf32>
    %c0_20 = arith.constant 0 : index
    %c0_21 = arith.constant 0 : index
    %c0_22 = arith.constant 0 : index
    %37 = vector.load %arg8[%c0_20, %c0_21, %c0_22] : memref<1x1x17xf32, #tpu.memory_space<vmem>>, vector<1x1x17xf32>
    %38 = vector.shape_cast %37 : vector<1x1x17xf32> to vector<1x17xf32>
    %39 = vector.broadcast %38 : vector<1x17xf32> to vector<64x17xf32>
    %40 = arith.addf %36, %39 : vector<64x17xf32>
    %cst_23 = arith.constant 0.000000e+00 : f32
    %41 = vector.broadcast %cst_23 : f32 to vector<64x17xf32>
    %42 = arith.maximumf %40, %41 : vector<64x17xf32>
    %43 = arith.truncf %42 : vector<64x17xf32> to vector<64x17xbf16>
    %c0_24 = arith.constant 0 : index
    %c0_25 = arith.constant 0 : index
    %c0_26 = arith.constant 0 : index
    %44 = vector.load %arg9[%c0_24, %c0_25, %c0_26] : memref<1x17x8xbf16, #tpu.memory_space<vmem>>, vector<1x17x8xbf16>
    %45 = vector.shape_cast %44 : vector<1x17x8xbf16> to vector<17x8xbf16>
    %cst_27 = arith.constant dense<0.000000e+00> : vector<64x8xf32>
    %46 = tpu.matmul %43, %45, %cst_27 {dimension_numbers = #tpu.dot_dimension_numbers<[1], [0], [0], [1], [0, 0, 1, 1], [], []>} : vector<64x17xbf16>, vector<17x8xbf16>, vector<64x8xf32> -> vector<64x8xf32>
    %c0_28 = arith.constant 0 : index
    %c0_29 = arith.constant 0 : index
    %c0_30 = arith.constant 0 : index
    %47 = vector.load %arg10[%c0_28, %c0_29, %c0_30] : memref<1x1x8xf32, #tpu.memory_space<vmem>>, vector<1x1x8xf32>
    %48 = vector.shape_cast %47 : vector<1x1x8xf32> to vector<1x8xf32>
    %49 = vector.broadcast %48 : vector<1x8xf32> to vector<64x8xf32>
    %50 = arith.addf %46, %49 : vector<64x8xf32>
    %cst_31 = arith.constant 0.000000e+00 : f32
    %51 = vector.broadcast %cst_31 : f32 to vector<64x8xf32>
    %52 = arith.maximumf %50, %51 : vector<64x8xf32>
    %53 = arith.truncf %52 : vector<64x8xf32> to vector<64x8xbf16>
    %c0_32 = arith.constant 0 : index
    %c0_33 = arith.constant 0 : index
    %c0_34 = arith.constant 0 : index
    %54 = vector.load %arg11[%c0_32, %c0_33, %c0_34] : memref<1x8x3xbf16, #tpu.memory_space<vmem>>, vector<1x8x3xbf16>
    %55 = vector.shape_cast %54 : vector<1x8x3xbf16> to vector<8x3xbf16>
    %cst_35 = arith.constant dense<0.000000e+00> : vector<64x3xf32>
    %56 = tpu.matmul %53, %55, %cst_35 {dimension_numbers = #tpu.dot_dimension_numbers<[1], [0], [0], [1], [0, 0, 1, 1], [], []>} : vector<64x8xbf16>, vector<8x3xbf16>, vector<64x3xf32> -> vector<64x3xf32>
    %c0_36 = arith.constant 0 : index
    %c0_37 = arith.constant 0 : index
    %c0_38 = arith.constant 0 : index
    %57 = vector.load %arg12[%c0_36, %c0_37, %c0_38] : memref<1x1x3xf32, #tpu.memory_space<vmem>>, vector<1x1x3xf32>
    %58 = vector.shape_cast %57 : vector<1x1x3xf32> to vector<1x3xf32>
    %59 = vector.broadcast %58 : vector<1x3xf32> to vector<64x3xf32>
    %60 = arith.addf %56, %59 : vector<64x3xf32>
    %61 = math.tanh %60 : vector<64x3xf32>
    %62 = vector.shape_cast %61 : vector<64x3xf32> to vector<2x32x3xf32>
    %c0_39 = arith.constant 0 : index
    %c0_40 = arith.constant 0 : index
    %c0_41 = arith.constant 0 : index
    %c0_42 = arith.constant 0 : index
    %63 = vector.load %arg13[%c0_39, %c0_40, %c0_41, %c0_42] : memref<1x2x32x3xf32, #tpu.memory_space<vmem>>, vector<1x2x32x3xf32>
    %64 = vector.shape_cast %63 : vector<1x2x32x3xf32> to vector<2x32x3xf32>
    %65 = vector.shape_cast %62 : vector<2x32x3xf32> to vector<1x2x32x3xf32>
    tpu.vector_store %arg13[%c0_39, %c0_40, %c0_41, %c0_42], %65 {strides = array<i32>} : memref<1x2x32x3xf32, #tpu.memory_space<vmem>>, vector<1x2x32x3xf32>,
    return
  }
  func.func @transform_0(%arg0: i32, %arg1: memref<4xi32, #tpu.memory_space<smem>>) -> (i32, i32, i32, i32) {
    %c0_i32 = arith.constant 0 : i32
    %c0_i32_0 = arith.constant 0 : i32
    %c0_i32_1 = arith.constant 0 : i32
    %c0_i32_2 = arith.constant 0 : i32
    return %arg0, %c0_i32, %c0_i32_0, %c0_i32_1 : i32, i32, i32, i32
  }
  func.func @transform_1(%arg0: i32, %arg1: memref<4xi32, #tpu.memory_space<smem>>) -> (i32, i32, i32) {
    %c0_i32 = arith.constant 0 : i32
    %c0_i32_0 = arith.constant 0 : i32
    %c0_i32_1 = arith.constant 0 : i32
    %c0_i32_2 = arith.constant 0 : i32
    return %c0_i32, %c0_i32_0, %c0_i32_1 : i32, i32, i32
  }
  func.func @transform_2(%arg0: i32, %arg1: memref<4xi32, #tpu.memory_space<smem>>) -> (i32, i32, i32) {
    %0 = arith.index_cast %arg0 : i32 to index
    %1 = memref.load %arg1[%0] : memref<4xi32, #tpu.memory_space<smem>>
    %c0_i32 = arith.constant 0 : i32
    %c0_i32_0 = arith.constant 0 : i32
    %c0_i32_1 = arith.constant 0 : i32
    return %1, %c0_i32, %c0_i32_0 : i32, i32, i32
  }
  func.func @transform_3(%arg0: i32, %arg1: memref<4xi32, #tpu.memory_space<smem>>) -> (i32, i32, i32) {
    %0 = arith.index_cast %arg0 : i32 to index
    %1 = memref.load %arg1[%0] : memref<4xi32, #tpu.memory_space<smem>>
    %c0_i32 = arith.constant 0 : i32
    %c0_i32_0 = arith.constant 0 : i32
    %c0_i32_1 = arith.constant 0 : i32
    return %1, %c0_i32, %c0_i32_0 : i32, i32, i32
  }
  func.func @transform_4(%arg0: i32, %arg1: memref<4xi32, #tpu.memory_space<smem>>) -> (i32, i32, i32) {
    %0 = arith.index_cast %arg0 : i32 to index
    %1 = memref.load %arg1[%0] : memref<4xi32, #tpu.memory_space<smem>>
    %c0_i32 = arith.constant 0 : i32
    %c0_i32_0 = arith.constant 0 : i32
    %c0_i32_1 = arith.constant 0 : i32
    return %1, %c0_i32, %c0_i32_0 : i32, i32, i32
  }
  func.func @transform_5(%arg0: i32, %arg1: memref<4xi32, #tpu.memory_space<smem>>) -> (i32, i32, i32) {
    %0 = arith.index_cast %arg0 : i32 to index
    %1 = memref.load %arg1[%0] : memref<4xi32, #tpu.memory_space<smem>>
    %c0_i32 = arith.constant 0 : i32
    %c0_i32_0 = arith.constant 0 : i32
    %c0_i32_1 = arith.constant 0 : i32
    return %1, %c0_i32, %c0_i32_0 : i32, i32, i32
  }
  func.func @transform_6(%arg0: i32, %arg1: memref<4xi32, #tpu.memory_space<smem>>) -> (i32, i32, i32) {
    %0 = arith.index_cast %arg0 : i32 to index
    %1 = memref.load %arg1[%0] : memref<4xi32, #tpu.memory_space<smem>>
    %c0_i32 = arith.constant 0 : i32
    %c0_i32_0 = arith.constant 0 : i32
    %c0_i32_1 = arith.constant 0 : i32
    return %1, %c0_i32, %c0_i32_0 : i32, i32, i32
  }
  func.func @transform_7(%arg0: i32, %arg1: memref<4xi32, #tpu.memory_space<smem>>) -> (i32, i32, i32) {
    %0 = arith.index_cast %arg0 : i32 to index
    %1 = memref.load %arg1[%0] : memref<4xi32, #tpu.memory_space<smem>>
    %c0_i32 = arith.constant 0 : i32
    %c0_i32_0 = arith.constant 0 : i32
    %c0_i32_1 = arith.constant 0 : i32
    return %1, %c0_i32, %c0_i32_0 : i32, i32, i32
  }
  func.func @transform_8(%arg0: i32, %arg1: memref<4xi32, #tpu.memory_space<smem>>) -> (i32, i32, i32) {
    %0 = arith.index_cast %arg0 : i32 to index
    %1 = memref.load %arg1[%0] : memref<4xi32, #tpu.memory_space<smem>>
    %c0_i32 = arith.constant 0 : i32
    %c0_i32_0 = arith.constant 0 : i32
    %c0_i32_1 = arith.constant 0 : i32
    return %1, %c0_i32, %c0_i32_0 : i32, i32, i32
  }
  func.func @transform_9(%arg0: i32, %arg1: memref<4xi32, #tpu.memory_space<smem>>) -> (i32, i32, i32) {
    %0 = arith.index_cast %arg0 : i32 to index
    %1 = memref.load %arg1[%0] : memref<4xi32, #tpu.memory_space<smem>>
    %c0_i32 = arith.constant 0 : i32
    %c0_i32_0 = arith.constant 0 : i32
    %c0_i32_1 = arith.constant 0 : i32
    return %1, %c0_i32, %c0_i32_0 : i32, i32, i32
  }
  func.func @transform_10(%arg0: i32, %arg1: memref<4xi32, #tpu.memory_space<smem>>) -> (i32, i32, i32) {
    %0 = arith.index_cast %arg0 : i32 to index
    %1 = memref.load %arg1[%0] : memref<4xi32, #tpu.memory_space<smem>>
    %c0_i32 = arith.constant 0 : i32
    %c0_i32_0 = arith.constant 0 : i32
    %c0_i32_1 = arith.constant 0 : i32
    return %1, %c0_i32, %c0_i32_0 : i32, i32, i32
  }
  func.func @transform_11(%arg0: i32, %arg1: memref<4xi32, #tpu.memory_space<smem>>) -> (i32, i32, i32, i32) {
    %c0_i32 = arith.constant 0 : i32
    %c0_i32_0 = arith.constant 0 : i32
    %c0_i32_1 = arith.constant 0 : i32
    %c0_i32_2 = arith.constant 0 : i32
    return %arg0, %c0_i32, %c0_i32_0, %c0_i32_1 : i32, i32, i32, i32
  }
}

</mosaic_0001>

<bundles_post_ra>
// kernel: ae_atlasnet_skeleton_forward.5
= control target key start
LH: loop header
LB: loop body
LE: loop exit
PB: predicated region body
PF: predicated region fallthrough
CT: control target
= control target key end

     0   :  { %s1713_s0 = inlined_call_operand.vmem [shape: s32[4], index: 0, kind: input, shape index: {}]   ;;  %s1714_s1 = inlined_call_operand.vmem [shape: f32[4,2,32,2], index: 1, kind: input, shape index: {}]   ;;  %s1715_s2 = inlined_call_operand.vmem [shape: f32[2,1,32], index: 2, kind: input, shape index: {}]   ;;  %s1716_s3 = inlined_call_operand.vmem [shape: f32[4,2,34], index: 3, kind: input, shape index: {}]   ;;  %s1717_s4 = inlined_call_operand.vmem [shape: bf16[4,32,34], index: 4, kind: input, shape index: {}]   ;;  %s1718_s5 = inlined_call_operand.vmem [shape: f32[4,1,34], index: 5, kind: input, shape index: {}]   ;;  %s1719_s6 = inlined_call_operand.vmem [shape: bf16[4,34,17], index: 6, kind: input, shape index: {}]   ;;  %s1720_s7 = inlined_call_operand.vmem [shape: f32[4,1,17], index: 7, kind: input, shape index: {}]   ;;  %s1721_s8 = inlined_call_operand.vmem [shape: bf16[4,17,8], index: 8, kind: input, shape index: {}]   ;;  %s1722_s9 = inlined_call_operand.vmem [shape: f32[4,1,8], index: 9, kind: input, shape index: {}]   ;;  %s1723_s10 = inlined_call_operand.vmem [shape: bf16[4,8,3], index: 10, kind: input, shape index: {}]   ;;  %s1724_s11 = inlined_call_operand.vmem [shape: f32[4,1,3], index: 11, kind: input, shape index: {}]   ;;  %s1725_s12 = inlined_call_operand.vmem [shape: f32[4,2,32,3], index: 12, kind: output, shape index: {}]  }
   0x1   :  { %s17_s23 = sshll.u32 %s1713_s0, 4  ;;  %s18_s23 = int_to_ptr.vmem [resolvable:$true] %s17_s23 }
   0x2   :  { %s1509_s24 = scalar_lea.vmem %s18_s23, 16  ;;  %p1514_p1 = scmp.lt.s32.totalorder %s18_s23, %s18_s23 }
   0x3   :  { %p1510_p0 = scmp.ne.s32.totalorder %s18_s23, %s1509_s24  ;;  %p1515_p2 = scmp.lt.s32.totalorder %s1509_s24, %s1509_s24 }
   0x5   :  { %p1516_p3 = por %p1515_p2, %p1514_p1 }
   0x7   :  { %p1517_p4 = pnand %p1516_p3, %p1510_p0 }
   0x9   :  { %1520 = shalt.err (!%p1517_p4)  }
   0xa   :  { %s1531_s25 = smov [#allocation3]  }
   0xb   :  { %20 = dma.vmem_to_smem %s18_s23, 16, %s1531_s25, [#allocation2] }
   0xc   :  { %1525 = dma.done.wait [#allocation2], 16 }
   0xd   :  { %1526 = vsyncadd [#allocation2], 4294967280 }
   0xe   :  { %22 = sfence }
   0xf   :  { %s1605_s26 = smov 0  }
  0x10 LB: > { %s1611_s0 = sadd.s32 4294967295, %s1529_s26   ;;  %p1350_p5 = scmp.ge.s32.totalorder %s1529_s26, 1  ;;  %s1529_s26 = sphi %s1605_s26, %s28_s26  }
  0x11   : > { %p460_p6 = scmp.lt.s32.totalorder %s1529_s26, 5 }
  0x13   : > { %p461_p7 = pnand %p1350_p5, %p460_p6 }
  0x14   : > { %s555_s27 = sld [smem:[#allocation3 + %s1611_s0]] (!%p461_p7)  ;;  %v1532_v0 = vmov (!%p461_p7), 0.0   ;;  %vm1533_vm0 = vmmov (!%p461_p7), 0   ;;  %v609_v1 = vld [vmem:[%s1715_s2 + $0x1] sm:$0x1] (!%p461_p7)  ;;  %p544_p8 = scmp.lt.s32.totalorder (!%p461_p7), %s1611_s0, 3  ;;  %v736_v34 = vlaneseq (!%p461_p7) }
  0x15   : > { %464 = sbr.rel (%p461_p7) target bundleno = 949 (0x3b5), region = 64  ;;  %1411 = vmatprep.subr.bf16.mxu0 (!%p461_p7), %v1532_v0  ;;  %1415 = vmatprep.mubr.msk.bf16.mxu0 (!%p461_p7), %vm1533_vm0, %v1532_v0  ;;  %v611_v2 = vpack.c.bf16 (!%p461_p7), %v609_v1, %v609_v1  ;;  %v1534_v3 = vmov (!%p461_p7), 1   ;;  %v608_v4 = vld [vmem:[%s1715_s2] sm:$0x1] (!%p461_p7)  ;;  %vm628_vm1 = vcmask (!%p461_p7), 1041409   ;;  %v1535_v13 = vmov (!%p461_p7), 0  }
  0x16   : > { %1476 = vset.pattern.permute.xlu1 (!%p461_p7), %v1534_v3  ;;  %1478 = vset.pattern.permute.xlu0 (!%p461_p7), %v1534_v3  ;;  %v610_v5 = vpack.c.bf16 (!%p461_p7), %v608_v4, %v608_v4  ;;  %vm643_vm2 = vcmask (!%p461_p7), 261120   ;;  %s567_s23 = sld [smem:[#allocation3 + %s1611_s0]] (!%p461_p7)  ;;  %vm893_vm3 = vcmask (!%p461_p7), 1040384   ;;  %v737_v36 = vshrl.u32 (!%p461_p7), %v736_v34, 7 }
  0x17   : > { %v626_v6 = vunpack.c.l.b16 (!%p461_p7), %v611_v2  ;;  %s549_s29 = sld [smem:[#allocation3 + %s1611_s0]] (!%p461_p7)  ;;  %v1536_v40 = vmov (!%p461_p7), 1966171168   ;;  %vm880_vm4 = vcmask (!%p461_p7), 277504   ;;  %vm993_vm5 = vcmask (!%p461_p7), 138240  }
  0x18   : > { %v625_v10 = vunpack.c.l.b16 (!%p461_p7), %v610_v5  ;;  %s562_s30 = sld [smem:[#allocation3 + %s1611_s0]] (!%p461_p7)  ;;  %v782_v38 = vsub.s32 (!%p461_p7), 1, %v737_v36  ;;  %v738_v39 = vsub.s32 (!%p461_p7), 0, %v737_v36  ;;  %v802_v41 = vunpack.c.l.s4 (!%p461_p7), %v1536_v40 }
  0x19   : > { %v627_v11 = vrot.slane (!%p461_p7), %v626_v6, 7  ;;  %s591_s16 = sld [smem:[#allocation3 + %s1611_s0]] (!%p461_p7)  ;;  %vm1109_vm6 = vcmask (!%p461_p7), 1043456   ;;  %vm1096_vm7 = vcmask (!%p461_p7), 64512   ;;  %vm1186_vm8 = vcmask (!%p461_p7), 23552  }
  0x1a   : > { %p556_p9 = scmp.lt.s32.totalorder (!%p461_p7), %s555_s27, 3  ;;  %v803_v47 = vunpack.c.0.s8 (!%p461_p7), %v802_v41  ;;  %s597_s25 = sld [smem:[#allocation3 + %s1611_s0]] (!%p461_p7) }
  0x1b   : > { %v629_v15 = vsel (!%p461_p7), %vm628_vm1, %v627_v11, %v625_v10 }
  0x1c   : > { %s1624_s14 = scalar_select %p544_p8, %s1611_s0, 3  ;;  %v630_v17 = vpack.c.b16 %v629_v15, %v629_v15  ;;  %v806_v53 = vsub.s32 %v803_v47, %v737_v36 }
  0x1d   : > { %s1727_s27 = smov (!%p556_p9, %s555_s27), 3  ;;  %p568_p10 = scmp.lt.s32.totalorder %s567_s23, 3 }
  0x1e   : > { %s1387_s15 = sshll.u32 %s1624_s14, 6  ;;  %s1388_s19 = sshll.u32 %s1727_s27, 4 }
  0x1f   : > { %s1632_s18 = scalar_lea.vmem %s1714_s1, %s1387_s15  ;;  %s560_s22 = scalar_lea.vmem %s1717_s4, %s1388_s19 }
  0x20   : > { %v687_v7 = vld [vmem:[%s1632_s18] sm:$0xff]  ;;  %v689_v8 = vld [vmem:[%s1632_s18 + $0x10] sm:$0xff]  ;;  %v688_v9 = vld [vmem:[%s1632_s18 + $0x8] sm:$0xff]  ;;  %s1729_s23 = smov (!%p568_p10, %s567_s23), 3  ;;  %p550_p11 = scmp.lt.s32.totalorder %s549_s29, 3 }
  0x21   : > { %749 = vperm.xlu1 %1476, %v687_v7   ;;  %757 = vperm.xlu0 %1478, %v689_v8   ;;  %v1486_v12 = vld [vmem:[%s560_s22] sm:$0xff]   ;;  %v1487_v14 = vld [vmem:[%s560_s22 + $0x8] sm:$0xff]   ;;  %v690_v16 = vld [vmem:[%s1632_s18 + $0x18] sm:$0xff]  ;;  %s1460_s24 = smul.u32 20, %s1729_s23  ;;  %p563_p12 = scmp.lt.s32.totalorder %s562_s30, 3 }
  0x22   : > { %1412 = vmatpush3.bf16.msra.mxu0 %v1486_v12  ;;  %v692_v18 = vld [vmem:[%s1632_s18 + $0x28] sm:$0xff]  ;;  %v691_v19 = vld [vmem:[%s1632_s18 + $0x20] sm:$0xff]  ;;  %v693_v20 = vld [vmem:[%s1632_s18 + $0x30] sm:$0xff]  ;;  %s1731_s29 = smov (!%p550_p11, %s549_s29), 3  ;;  %s579_s22 = sld [smem:[#allocation3 + %s1611_s0]] }
  0x23   : > { %1413 = vmatprep.subr.bf16.mxu0 %v1532_v0  ;;  %v694_v21 = vld [vmem:[%s1632_s18 + $0x38] sm:$0xff]  ;;  %s572_s28 = scalar_lea.vmem %s1719_s6, %s1460_s24  ;;  %s1353_s13 = sshll.u32 %s1731_s29, 1 }
  0x24   : > { %v1488_v22 = vld [vmem:[%s572_s28] sm:$0xff]   ;;  %v1489_v23 = vld [vmem:[%s572_s28 + $0x8] sm:$0xff]   ;;  %v1490_v24 = vld [vmem:[%s572_s28 + $0x10] ss:$0 sps:$4 sm:$0x11]   ;;  %s553_s18 = scalar_lea.vmem %s1716_s3, %s1353_s13  ;;  %s1733_s30 = smov (!%p563_p12, %s562_s30), 3 }
  0x25   : > { %753 = vperm.xlu1 %1476, %v688_v9   ;;  %1479 = vset.pattern.permute.xlu0 %v1535_v13  ;;  %v895_v25 = vsel %vm893_vm3, %v1490_v24, 0  ;;  %v695_v42 = vld [vmem:[%s553_s18] sm:$0x3]  ;;  %s565_s21 = scalar_lea.vmem %s1718_s5, %s1733_s30  ;;  %s574_s28 = sld [smem:[#allocation3 + %s1611_s0]] }
  0x26   : > { %698 = vperm.xlu0 %1479, %v687_v7   ;;  %1414 = vmatpush3.bf16.msra.mxu0 %v1487_v14  ;;  %v783_v45 = vrot.slane %v695_v42, %v782_v38  ;;  %v739_v46 = vrot.slane %v695_v42, %v738_v39  ;;  %v1361_v50 = vld [vmem:[%s565_s21] ss:$0 sm:$0xff]  ;;  %p592_p1 = scmp.lt.s32.totalorder %s591_s16, 3  ;;  %s586_s21 = sld [smem:[#allocation3 + %s1611_s0]] }
  0x27   : > { %1419 = vmatprep.subr.bf16.mxu1 %v1488_v22  ;;  %p598_p3 = scmp.lt.s32.totalorder %s597_s25, 3 }
  0x28   : > { %1420 = vmatpush3.bf16.msra.mxu1 %v1488_v22  ;;  %p580_p13 = scmp.lt.s32.totalorder %s579_s22, 3  ;;  %s1739_s16 = smov (!%p592_p1, %s591_s16), 3 }
  0x29   : > { %1477 = vset.pattern.permute.xlu1 %v1535_v13  ;;  %1416 = vmatmul.mubr.msk.bf16.vlgmr.msra.gmra.mrb[0].mxu0 %vm643_vm2, %v630_v17  ;;  %s1358_s17 = sshll.u32 %s1739_s16, 2  ;;  %s1743_s25 = smov (!%p598_p3, %s597_s25), 3 }
  0x2a   : > { %713 = vperm.xlu1 %1477, %v690_v16   ;;  %703 = vperm.xlu0 %1479, %v688_v9   ;;  %s1735_s22 = smov (!%p580_p13, %s579_s22), 3  ;;  %s595_s20 = scalar_lea.vmem %s1723_s10, %s1358_s17 }
  0x2b   : > { %1421 = vmatprep.subr.bf16.mxu1 %v1489_v23  ;;  %s1461_s23 = smul.u32 12, %s1735_s22  ;;  %p575_p0 = scmp.lt.s32.totalorder %s574_s28, 3 }
  0x2c   : > { %1422 = vmatpush3.bf16.msra.mxu1 %v1489_v23  ;;  %p587_p2 = scmp.lt.s32.totalorder %s586_s21, 3  ;;  %s600_s29 = scalar_lea.vmem %s1724_s11, %s1743_s25 }
  0x2d   : > { %1457 = vmatprep.subr.msk.bf16.mxu1 %vm893_vm3, %v1490_v24  ;;  %s584_s27 = scalar_lea.vmem %s1721_s8, %s1461_s23  ;;  %s1737_s28 = smov (!%p575_p0, %s574_s28), 3 }
  0x2e   : > { %1480 = vset.pattern.permute.xlu1 %v1534_v3  ;;  %708 = vperm.xlu0 %1479, %v689_v8   ;;  %v1492_v47 = vld [vmem:[%s584_s27 + $0x8] ss:$0 sps:$4 sm:$0x11]   ;;  %s577_s13 = scalar_lea.vmem %s1720_s7, %s1737_s28  ;;  %s1741_s21 = smov (!%p587_p2, %s586_s21), 3 }
  0x2f   : > { %761 = vperm.xlu1 %1480, %v690_v16   ;;  %s589_s24 = scalar_lea.vmem %s1722_s9, %s1741_s21 }
  0x30   : > { %1424 = vmatpush3.bf16.msra.mxu1 %v895_v25 }
  0x32   : > { %723 = vperm.xlu0 %1479, %v692_v18  }
  0x33   : > { %1481 = vset.pattern.permute.xlu1 %v1535_v13 }
  0x34   : > { %718 = vperm.xlu1 %1481, %v691_v19  }
  0x36   : > { %728 = vperm.xlu0 %1479, %v693_v20  }
  0x38   : > { %1482 = vset.pattern.permute.xlu1 %v1534_v3 }
  0x39   : > { %765 = vperm.xlu1 %1482, %v691_v19  }
  0x3a   : > { %1484 = vset.pattern.permute.xlu0 %v1534_v3 }
  0x3b   : > { %773 = vperm.xlu0 %1484, %v693_v20  }
  0x3d   : > { %769 = vperm.xlu1 %1482, %v692_v18  }
  0x41   : > { %1483 = vset.pattern.permute.xlu1 %v1535_v13 }
  0x42   : > { %733 = vperm.xlu1 %1483, %v694_v21  }
  0x46   : > { %1485 = vset.pattern.permute.xlu1 %v1534_v3 }
  0x47   : > { %777 = vperm.xlu1 %1485, %v694_v21  }
  0xa0   : > { %v750_v26 = vpop.permute.xlu1 %749  ;;  %v758_v28 = vpop.permute.xlu0 %757 }
  0xa1   : > { %v784_v51 = vmul.f32 %v783_v45, %v750_v26  ;;  %v786_v54 = vmul.f32 %v783_v45, %v758_v28 }
  0xa4   : > { %v754_v27 = vpop.permute.xlu1 %753 }
  0xa5   : > { %v699_v30 = vpop.permute.xlu0 %698  ;;  %v785_v55 = vmul.f32 %v783_v45, %v754_v27 }
  0xa6   : > { %v740_v52 = vmul.f32 %v739_v46, %v699_v30 }
  0xa8   : > { %v792_v62 = vadd.f32 %v784_v51, %v740_v52 }
  0xa9   : > { %v714_v29 = vpop.permute.xlu1 %713  ;;  %v704_v32 = vpop.permute.xlu0 %703 }
  0xaa   : > { %v741_v56 = vmul.f32 %v739_v46, %v704_v32  ;;  %v743_v3 = vmul.f32 %v739_v46, %v714_v29 }
  0xac   : > { %v793_v2 = vadd.f32 %v785_v55, %v741_v56 }
  0xad   : > { %v709_v35 = vpop.permute.xlu0 %708 }
  0xae   : > { %v762_v31 = vpop.permute.xlu1 %761  ;;  %v742_v57 = vmul.f32 %v739_v46, %v709_v35 }
  0xaf   : > { %v787_v5 = vmul.f32 %v783_v45, %v762_v31 }
  0xb0   : > { %v794_v4 = vadd.f32 %v786_v54, %v742_v57 }
  0xb1   : > { %v724_v43 = vpop.permute.xlu0 %723  ;;  %v795_v20 = vadd.f32 %v787_v5, %v743_v3 }
  0xb2   : > { %v745_v7 = vmul.f32 %v739_v46, %v724_v43 }
  0xb3   : > { %v719_v33 = vpop.permute.xlu1 %718 }
  0xb4   : > { %v744_v8 = vmul.f32 %v739_v46, %v719_v33 }
  0xb5   : > { %v729_v49 = vpop.permute.xlu0 %728 }
  0xb6   : > { %v746_v16 = vmul.f32 %v739_v46, %v729_v49 }
  0xb8   : > { %v766_v37 = vpop.permute.xlu1 %765 }
  0xb9   : > { %v788_v11 = vmul.f32 %v783_v45, %v766_v37 }
  0xba   : > { %v774_v6 = vpop.permute.xlu0 %773 }
  0xbb   : > { %v790_v17 = vmul.f32 %v783_v45, %v774_v6  ;;  %v796_v25 = vadd.f32 %v788_v11, %v744_v8 }
  0xbc   : > { %v770_v44 = vpop.permute.xlu1 %769 }
  0xbd   : > { %v789_v12 = vmul.f32 %v783_v45, %v770_v44  ;;  %v798_v29 = vadd.f32 %v790_v17, %v746_v16  ;;  %v1373_v17 = vld [vmem:[%s589_s24] ss:$0 sm:$0xff] }
  0xbf   : > { %v797_v26 = vadd.f32 %v789_v12, %v745_v7 }
  0xc1   : > { %v734_v48 = vpop.permute.xlu1 %733 }
  0xc2   : > { %v747_v14 = vmul.f32 %v739_v46, %v734_v48  ;;  %v1491_v46 = vld [vmem:[%s584_s27] sm:$0xff]   ;;  %v1007_v48 = vsel %vm893_vm3, 65535, %v1535_v13 }
  0xc3   : > { %1433 = vmatprep.subr.bf16.mxu0 %v1491_v46  ;;  %v1009_v49 = vand.u32 %v1492_v47, %v1007_v48 }
  0xc4   : > { %1434 = vmatpush3.bf16.msra.mxu0 %v1491_v46  ;;  %v1380_v46 = vld [vmem:[%s600_s29] ss:$0 sm:$0xff] }
  0xc5   : > { %1435 = vmatprep.subr.bf16.mxu0 %v1009_v49 }
  0xc6   : > { %v778_v1 = vpop.permute.xlu1 %777 }
  0xc7   : > { %v791_v15 = vmul.f32 %v783_v45, %v778_v1 }
  0xc8   : > { %1436 = vmatpush3.bf16.msra.mxu0 %v1009_v49 }
  0xc9   : > { %v799_v27 = vadd.f32 %v791_v15, %v747_v14  ;;  %v1088_v15 = vld [vmem:[%s595_s20] sm:$0xf] }
  0xca   : > { %1458 = vmatprep.subr.msk.bf16.mxu0 %vm1109_vm6, %v1088_v15  ;;  %1459 = vmatprep.subr.msk.bf16.mxu1 %vm1109_vm6, %v1088_v15  ;;  %v1111_v16 = vsel %vm1109_vm6, %v1088_v15, 0 }
  0xfc   : > { %v681_v58 = vpop.f32.mrb[0].mxu0 }
  0xfd   : > { %v682_v59 = vadd.f32 %v1361_v50, %v681_v58  ;;  %v1417_v60 = vpop.f32.mrb[1].mxu0  ;;  %v1365_v50 = vld [vmem:[%s577_s13] ss:$0 sm:$0xff]  ;;  %s606_s13 = scalar_lea.vmem %s1725_s12, %s1387_s15 }
  0xfe   : > { %v684_v61 = vpop.f32.mrb[2].mxu0 }
  0xff   : > { %v807_v63 = vrot.slane %v682_v59, %v806_v53  ;;  %v1418_v0 = vpop.f32.mrb[3].mxu0 }
 0x101   : > { %v808_v9 = vcombine.high %v807_v63, %v807_v63  ;;  %v815_v10 = vrot.slane %v807_v63, %v806_v53 }
 0x103   : > { %v822_v18 = vrot.slane %v808_v9, %v806_v53  ;;  %v826_v19 = vrot.slane %v815_v10, %v738_v39 }
 0x105   : > { %v830_v21 = vrot.slane %v822_v18, %v738_v39  ;;  %v833_v22 = vadd.f32 %v826_v19, %v792_v62  ;;  %v834_v23 = vadd.f32 %v826_v19, %v793_v2  ;;  %v835_v24 = vadd.f32 %v826_v19, %v794_v4 }
 0x106   : > { %v836_v28 = vadd.f32 %v826_v19, %v795_v20 }
 0x107   : > { %v841_v30 = vmax.f32 %v833_v22, 0.0  ;;  %v842_v31 = vmax.f32 %v834_v23, 0.0  ;;  %v843_v32 = vmax.f32 %v835_v24, 0.0  ;;  %v837_v34 = vadd.f32 %v830_v21, %v796_v25 }
 0x108   : > { %v844_v33 = vmax.f32 %v836_v28, 0.0  ;;  %v838_v35 = vadd.f32 %v830_v21, %v797_v26  ;;  %v839_v36 = vadd.f32 %v830_v21, %v798_v29  ;;  %v840_v38 = vadd.f32 %v830_v21, %v799_v27 }
 0x109   : > { %v849_v37 = vpack.c.bf16 %v842_v31, %v841_v30  ;;  %v845_v40 = vmax.f32 %v837_v34, 0.0 }
 0x10a   : > { %v850_v39 = vpack.c.bf16 %v844_v33, %v843_v32  ;;  %v846_v41 = vmax.f32 %v838_v35, 0.0  ;;  %v847_v43 = vmax.f32 %v839_v36, 0.0  ;;  %v848_v44 = vmax.f32 %v840_v38, 0.0 }
 0x10b   : > { %1425 = vmatprep.mubr.msk.bf16.mxu1 %vm880_vm4, %v849_v37 }
 0x10c   : > { %1426 = vmatmul.mubr.msk.bf16.vlgmr.msra.gmra.mrb[0].mxu1 %vm880_vm4, %v850_v39  ;;  %v851_v42 = vpack.c.bf16 %v846_v41, %v845_v40  ;;  %v852_v45 = vpack.c.bf16 %v848_v44, %v847_v43 }
 0x10d   : > { %1456 = vmatpush3.bf16.msra.mxu1 %v1111_v16 }
 0x10e   : > { %1429 = vmatprep.mubr.msk.bf16.mxu1 %vm880_vm4, %v851_v42 }
 0x114   : > { %1430 = vmatmul.mubr.msk.bf16.gmra.mrb[4].mxu1 %vm880_vm4, %v852_v45 }
 0x1df   : > { %v1427_v51 = vpop.f32.mrb[0].mxu1 }
 0x1e0   : > { %v940_v52 = vadd.f32 %v1427_v51, %v1365_v50  ;;  %v931_v53 = vpop.f32.mrb[1].mxu1 }
 0x1e1   : > { %v932_v54 = vadd.f32 %v1365_v50, %v931_v53  ;;  %v1428_v55 = vpop.f32.mrb[2].mxu1 }
 0x1e2   : > { %v943_v56 = vadd.f32 %v1428_v55, %v1365_v50  ;;  %v934_v57 = vpop.f32.mrb[3].mxu1  ;;  %v964_v13 = vmax.f32 %v940_v52, 0.0 }
 0x1e3   : > { %v935_v58 = vadd.f32 %v1365_v50, %v934_v57  ;;  %v962_v60 = vmax.f32 %v932_v54, 0.0 }
 0x1e4   : > { %v965_v59 = vmax.f32 %v943_v56, 0.0 }
 0x1e5   : > { %v963_v61 = vmax.f32 %v935_v58, 0.0 }
 0x1e6   : > { %v971_v62 = vpack.c.bf16 %v965_v59, %v964_v13 }
 0x1e7   : > { %v970_v63 = vpack.c.bf16 %v963_v61, %v962_v60  ;;  %v1431_v0 = vpop.f32.mrb[4].mxu1 }
 0x1e8   : > { %v956_v1 = vadd.f32 %v1431_v0, %v1365_v50  ;;  %v947_v2 = vpop.f32.mrb[5].mxu1 }
 0x1e9   : > { %v948_v3 = vadd.f32 %v1365_v50, %v947_v2  ;;  %v1432_v4 = vpop.f32.mrb[6].mxu1  ;;  %1437 = vmatprep.mubr.msk.bf16.mxu0 %vm993_vm5, %v970_v63 }
 0x1ea   : > { %v959_v5 = vadd.f32 %v1432_v4, %v1365_v50  ;;  %v950_v6 = vpop.f32.mrb[7].mxu1  ;;  %1438 = vmatmul.mubr.msk.bf16.vlgmr.msra.gmra.mrb[4].mxu0 %vm993_vm5, %v971_v62  ;;  %v968_v8 = vmax.f32 %v956_v1, 0.0 }
 0x1eb   : > { %v951_v7 = vadd.f32 %v1365_v50, %v950_v6  ;;  %v966_v10 = vmax.f32 %v948_v3, 0.0  ;;  %1446 = vmatpush3.bf16.msra.mxu0 %v1111_v16 }
 0x1ec   : > { %v969_v9 = vmax.f32 %v959_v5, 0.0 }
 0x1ed   : > { %v967_v11 = vmax.f32 %v951_v7, 0.0 }
 0x1ee   : > { %v973_v12 = vpack.c.bf16 %v969_v9, %v968_v8 }
 0x1ef   : > { %v972_v14 = vpack.c.bf16 %v967_v11, %v966_v10 }
 0x1f1   : > { %1441 = vmatprep.mubr.msk.bf16.mxu0 %vm993_vm5, %v972_v14 }
 0x1f2   : > { %1442 = vmatmul.mubr.msk.bf16.gmra.mrb[8].mxu0 %vm993_vm5, %v973_v12 }
 0x2bd   : > { %v1439_v18 = vpop.f32.mrb[4].mxu0 }
 0x2be   : > { %v1054_v19 = vadd.f32 %v1439_v18, %v1373_v17  ;;  %v1045_v20 = vpop.f32.mrb[5].mxu0 }
 0x2bf   : > { %v1046_v21 = vadd.f32 %v1373_v17, %v1045_v20  ;;  %v1440_v22 = vpop.f32.mrb[6].mxu0 }
 0x2c0   : > { %v1057_v23 = vadd.f32 %v1440_v22, %v1373_v17  ;;  %v1048_v24 = vpop.f32.mrb[7].mxu0  ;;  %v1078_v26 = vmax.f32 %v1054_v19, 0.0 }
 0x2c1   : > { %v1049_v25 = vadd.f32 %v1373_v17, %v1048_v24  ;;  %v1076_v28 = vmax.f32 %v1046_v21, 0.0 }
 0x2c2   : > { %v1079_v27 = vmax.f32 %v1057_v23, 0.0 }
 0x2c3   : > { %v1077_v29 = vmax.f32 %v1049_v25, 0.0 }
 0x2c4   : > { %v1085_v30 = vpack.c.bf16 %v1079_v27, %v1078_v26 }
 0x2c5   : > { %v1084_v31 = vpack.c.bf16 %v1077_v29, %v1076_v28  ;;  %v1443_v32 = vpop.f32.mrb[8].mxu0 }
 0x2c6   : > { %v1070_v33 = vadd.f32 %v1443_v32, %v1373_v17  ;;  %v1061_v34 = vpop.f32.mrb[9].mxu0 }
 0x2c7   : > { %v1062_v35 = vadd.f32 %v1373_v17, %v1061_v34  ;;  %v1444_v36 = vpop.f32.mrb[10].mxu0  ;;  %1447 = vmatprep.mubr.msk.bf16.mxu0 %vm1096_vm7, %v1084_v31 }
 0x2c8   : > { %v1073_v37 = vadd.f32 %v1444_v36, %v1373_v17  ;;  %v1064_v38 = vpop.f32.mrb[11].mxu0  ;;  %1448 = vmatmul.mubr.msk.bf16.vlgmr.msra.gmra.mrb[12].mxu0 %vm1096_vm7, %v1085_v30  ;;  %v1082_v40 = vmax.f32 %v1070_v33, 0.0 }
 0x2c9   : > { %v1065_v39 = vadd.f32 %v1373_v17, %v1064_v38  ;;  %v1080_v42 = vmax.f32 %v1062_v35, 0.0 }
 0x2ca   : > { %v1083_v41 = vmax.f32 %v1073_v37, 0.0 }
 0x2cb   : > { %v1081_v43 = vmax.f32 %v1065_v39, 0.0 }
 0x2cc   : > { %v1087_v44 = vpack.c.bf16 %v1083_v41, %v1082_v40 }
 0x2cd   : > { %v1086_v45 = vpack.c.bf16 %v1081_v43, %v1080_v42 }
 0x2cf   : > { %1451 = vmatprep.mubr.msk.bf16.mxu1 %vm1096_vm7, %v1086_v45 }
 0x2d0   : > { %1452 = vmatmul.mubr.msk.bf16.vlgmr.msra.gmra.mrb[8].mxu1 %vm1096_vm7, %v1087_v44 }
 0x39b   : > { %v1449_v47 = vpop.f32.mrb[12].mxu0 }
 0x39c   : > { %v1156_v48 = vadd.f32 %v1449_v47, %v1380_v46  ;;  %v1147_v49 = vpop.f32.mrb[13].mxu0 }
 0x39d   : > { %v1148_v50 = vadd.f32 %v1380_v46, %v1147_v49  ;;  %v1450_v51 = vpop.f32.mrb[14].mxu0 }
 0x39e   : > { %1493 = vtanh.f32 %v1156_v48  ;;  %v1159_v52 = vadd.f32 %v1450_v51, %v1380_v46  ;;  %v1150_v53 = vpop.f32.mrb[15].mxu0 }
 0x39f   : > { %1495 = vtanh.f32 %v1148_v50  ;;  %v1151_v54 = vadd.f32 %v1380_v46, %v1150_v53 }
 0x3a0   : > { %1497 = vtanh.f32 %v1159_v52 }
 0x3a1   : > { %1499 = vtanh.f32 %v1151_v54 }
 0x3a3   : > { %v1453_v55 = vpop.f32.mrb[8].mxu1 }
 0x3a4   : > { %v1172_v56 = vadd.f32 %v1453_v55, %v1380_v46  ;;  %v1163_v57 = vpop.f32.mrb[9].mxu1 }
 0x3a5   : > { %v1164_v58 = vadd.f32 %v1380_v46, %v1163_v57  ;;  %v1454_v13 = vpop.f32.mrb[10].mxu1 }
 0x3a6   : > { %1501 = vtanh.f32 %v1172_v56  ;;  %v1175_v59 = vadd.f32 %v1454_v13, %v1380_v46  ;;  %v1166_v60 = vpop.f32.mrb[11].mxu1 }
 0x3a7   : > { %1503 = vtanh.f32 %v1164_v58  ;;  %v1167_v61 = vadd.f32 %v1380_v46, %v1166_v60 }
 0x3a8   : > { %v1494_v62 = vpop.eup %1493  ;;  %1505 = vtanh.f32 %v1175_v59 }
 0x3a9   : > { %v1496_v63 = vpop.eup %1495  ;;  %1189 = vst.msk [vmem:[%s606_s13 + $0x10] sm:$0xff] %vm1186_vm8, %v1494_v62  ;;  %1507 = vtanh.f32 %v1167_v61 }
 0x3aa   : > { %v1498_v0 = vpop.eup %1497  ;;  %1187 = vst.msk [vmem:[%s606_s13] sm:$0xff] %vm1186_vm8, %v1496_v63 }
 0x3ab   : > { %v1500_v1 = vpop.eup %1499  ;;  %1190 = vst.msk [vmem:[%s606_s13 + $0x18] sm:$0xff] %vm1186_vm8, %v1498_v0 }
 0x3ac   : > { %1188 = vst.msk [vmem:[%s606_s13 + $0x8] sm:$0xff] %vm1186_vm8, %v1500_v1 }
 0x3b0   : > { %v1502_v2 = vpop.eup %1501 }
 0x3b1   : > { %v1504_v3 = vpop.eup %1503  ;;  %1193 = vst.msk [vmem:[%s606_s13 + $0x30] sm:$0xff] %vm1186_vm8, %v1502_v2 }
 0x3b2   : > { %v1506_v4 = vpop.eup %1505  ;;  %1191 = vst.msk [vmem:[%s606_s13 + $0x20] sm:$0xff] %vm1186_vm8, %v1504_v3 }
 0x3b3   : > { %v1508_v5 = vpop.eup %1507  ;;  %1194 = vst.msk [vmem:[%s606_s13 + $0x38] sm:$0xff] %vm1186_vm8, %v1506_v4 }
 0x3b4   : > { %1192 = vst.msk [vmem:[%s606_s13 + $0x28] sm:$0xff] %vm1186_vm8, %v1508_v5 }
 0x3b5 PF: > { %s28_s26 = sadd.s32 1, %s1529_s26  }
 0x3b6   : > { %p25_p4 = scmp.ge.s32.totalorder %s28_s26, 6  }
 0x3b8   :  { %27 = sbr.rel (!%p25_p4) target bundleno = 16 (0x10), region = 121 }

// kernel: ae_atlasnet_skeleton_forward.4
= control target key start
LH: loop header
LB: loop body
LE: loop exit
PB: predicated region body
PF: predicated region fallthrough
CT: control target
= control target key end

     0   :  { %s2733_s30 = smov 0   ;;  %s2735_s10 = smov 0   ;;  %s3400_s0 = inlined_call_operand.vmem [shape: f32[2,64,3], index: 0, kind: input, shape index: {}]   ;;  %s3401_s1 = inlined_call_operand.vmem [shape: bf16[3,64], index: 1, kind: input, shape index: {}]   ;;  %s3402_s2 = inlined_call_operand.vmem [shape: f32[1,64], index: 2, kind: input, shape index: {}]   ;;  %s3403_s3 = inlined_call_operand.vmem [shape: bf16[64,128], index: 3, kind: input, shape index: {}]   ;;  %s3404_s4 = inlined_call_operand.vmem [shape: f32[1,128], index: 4, kind: input, shape index: {}]   ;;  %s3405_s5 = inlined_call_operand.vmem [shape: bf16[128,1024], index: 5, kind: input, shape index: {}]   ;;  %s3406_s6 = inlined_call_operand.vmem [shape: f32[1,1024], index: 6, kind: input, shape index: {}]   ;;  %s3407_s7 = inlined_call_operand.vmem [shape: bf16[1024,32], index: 7, kind: input, shape index: {}]   ;;  %s3408_s8 = inlined_call_operand.vmem [shape: f32[1,32], index: 8, kind: input, shape index: {}]   ;;  %s3409_s9 = inlined_call_operand.vmem [shape: f32[2,1,32], index: 9, kind: output, shape index: {}]  }
   0x1   :  { %s2737_s11 = smov 0  }
   0x2 LB: > { %s31_s12 = sadd.s32 1, %s2674_s10  ;;  %p2286_p0 = scmp.ge.s32.totalorder %s2678_s11, 1  ;;  %s2678_s11 = sphi %s2737_s11, %s19_s11   ;;  %s2674_s10 = sphi %s2735_s10, %s3411_s10   ;;  %s2670_s30 = sphi %s2733_s30, %s3410_s30  }
   0x3   : > { %p33_p1 = scmp.ge.s32.totalorder %s31_s12, 2  ;;  %p306_p2 = scmp.lt.s32.totalorder %s2678_s11, 3 }
   0x5   : > { %s3413_s12 = smov (%p33_p1, %s31_s12), 0  ;;  %p307_p3 = pnand %p2286_p0, %p306_p2 }
   0x6   : > { %v370_v0 = vld [vmem:[%s3401_s1] sm:$0x3] (!%p307_p3)  ;;  %vm391_vm0 = vcmask (!%p307_p3), 1040384   ;;  %vm392_vm1 = vcmask (!%p307_p3), 1041408   ;;  %p345_p4 = scmp.lt.s32.totalorder (!%p307_p3), %s2670_s30, 1  ;;  %v2680_v1 = vmov (!%p307_p3), 65535  }
   0x7   : > { %310 = sbr.rel (%p307_p3) target bundleno = 1020 (0x3fc), region = 56  ;;  %v393_v2 = vsel (!%p307_p3), %vm391_vm0, 4294967295, %v2680_v1  ;;  %v2588_v4 = vld [vmem:[%s3403_s3] sm:$0xff] (!%p307_p3)   ;;  %v2589_v5 = vld [vmem:[%s3403_s3 + $0x8] sm:$0xff] (!%p307_p3)   ;;  %vm378_vm2 = vcmask (!%p307_p3), 23552   ;;  %v2590_v19 = vld [vmem:[%s3403_s3 + $0x10] sm:$0xff] (!%p307_p3)  }
   0x8   : > { %v394_v3 = vsel (!%p307_p3), %vm392_vm1, %v393_v2, 0  ;;  %2545 = vmatprep.subr.bf16.mxu1 (!%p307_p3), %v2588_v4  ;;  %v2591_v20 = vld [vmem:[%s3403_s3 + $0x18] sm:$0xff] (!%p307_p3)   ;;  %v604_v21 = vld [vmem:[%s3405_s5] sm:$0xff] (!%p307_p3)  ;;  %v2785_v23 = vld [vmem:[%s3405_s5 + $0x8] sm:$0xff] (!%p307_p3)  ;;  %vm514_vm3 = vcmask (!%p307_p3), 523264   ;;  %vm2219_vm4 = vcmask (!%p307_p3), 253952  }
   0x9   : > { %v396_v6 = vand.u32 (!%p307_p3), %v394_v3, %v370_v0  ;;  %2546 = vmatpush3.bf16.msra.mxu1 (!%p307_p3), %v2588_v4  ;;  %v608_v22 = vld [vmem:[%s3405_s5 + $0x20] sm:$0xff] (!%p307_p3)  ;;  %v2790_v26 = vld [vmem:[%s3405_s5 + $0x28] sm:$0xff] (!%p307_p3) }
   0xa   : > { %2547 = vmatprep.subr.bf16.mxu1 (!%p307_p3), %v2589_v5  ;;  %v2303_v24 = vcombine.low (!%p307_p3), %v604_v21, %v608_v22  ;;  %v2304_v25 = vcombine.high (!%p307_p3), %v604_v21, %v608_v22  ;;  %v612_v27 = vld [vmem:[%s3405_s5 + $0x40] sm:$0xff] (!%p307_p3)  ;;  %v2305_v29 = vcombine.low (!%p307_p3), %v2785_v23, %v2790_v26  ;;  %v2306_v30 = vcombine.high (!%p307_p3), %v2785_v23, %v2790_v26  ;;  %v613_v62 = vld [vmem:[%s3405_s5 + $0x48] sm:$0xff] (!%p307_p3) }
   0xb   : > { %2535 = vmatprep.subr.bf16.mxu0 (!%p307_p3), %v396_v6  ;;  %v616_v28 = vld [vmem:[%s3405_s5 + $0x60] sm:$0xff] (!%p307_p3)  ;;  %v617_v63 = vld [vmem:[%s3405_s5 + $0x68] sm:$0xff] (!%p307_p3) }
   0xc   : > { %2536 = vmatpush3.bf16.msra.mxu0 (!%p307_p3), %v396_v6  ;;  %v2312_v31 = vcombine.high (!%p307_p3), %v612_v27, %v616_v28  ;;  %v620_v32 = vld [vmem:[%s3405_s5 + $0x80] sm:$0xff] (!%p307_p3)  ;;  %v2311_v34 = vcombine.low (!%p307_p3), %v612_v27, %v616_v28  ;;  %v641_v26 = vld [vmem:[%s3405_s5 + $0x128] sm:$0xff] (!%p307_p3) }
   0xd   : > { %2548 = vmatpush3.bf16.msra.mxu1 (!%p307_p3), %v2589_v5  ;;  %1030 = vmatprep.subr.bf16.mxu0 (!%p307_p3), %v2304_v25  ;;  %v624_v33 = vld [vmem:[%s3405_s5 + $0xa0] sm:$0xff] (!%p307_p3)  ;;  %v2314_v5 = vcombine.high (!%p307_p3), %v613_v62, %v617_v63  ;;  %v637_v25 = vld [vmem:[%s3405_s5 + $0x108] sm:$0xff] (!%p307_p3) }
   0xe   : > { %s3415_s30 = smov (!%p345_p4, %s2670_s30), 1  ;;  %2549 = vmatprep.subr.bf16.mxu1 %v2590_v19  ;;  %v2320_v35 = vcombine.high %v620_v32, %v624_v33  ;;  %v628_v36 = vld [vmem:[%s3405_s5 + $0xc0] sm:$0xff]  ;;  %v2319_v38 = vcombine.low %v620_v32, %v624_v33  ;;  %v2338_v28 = vcombine.high %v637_v25, %v641_v26 }
   0xf   : > { %s2433_s19 = sshll.u32 %s3415_s30, 6  ;;  %v632_v37 = vld [vmem:[%s3405_s5 + $0xe0] sm:$0xff]  ;;  %s356_s21 = scalar_lea.vmem %s3409_s9, %s3415_s30 }
  0x10   : > { %s352_s22 = scalar_lea.vmem %s3400_s0, %s2433_s19  ;;  %v2328_v39 = vcombine.high %v628_v36, %v632_v37  ;;  %v636_v40 = vld [vmem:[%s3405_s5 + $0x100] sm:$0xff]  ;;  %v2327_v42 = vcombine.low %v628_v36, %v632_v37  ;;  %v653_v36 = vld [vmem:[%s3405_s5 + $0x188] sm:$0xff] }
  0x11   : > { %v358_v7 = vld [vmem:[%s352_s22] sm:$0xff]  ;;  %v359_v8 = vld [vmem:[%s352_s22 + $0x8] sm:$0xff]  ;;  %v360_v9 = vld [vmem:[%s352_s22 + $0x10] sm:$0xff]  ;;  %2550 = vmatpush3.bf16.msra.mxu1 %v2590_v19 }
  0x12   : > { %v366_v10 = vpack.c.bf16 %v359_v8, %v358_v7  ;;  %v361_v11 = vld [vmem:[%s352_s22 + $0x18] sm:$0xff]  ;;  %v362_v12 = vld [vmem:[%s352_s22 + $0x20] sm:$0xff]  ;;  %v363_v13 = vld [vmem:[%s352_s22 + $0x28] sm:$0xff]  ;;  %2551 = vmatprep.subr.bf16.mxu1 %v2591_v20 }
  0x13   : > { %v367_v14 = vpack.c.bf16 %v361_v11, %v360_v9  ;;  %v368_v15 = vpack.c.bf16 %v363_v13, %v362_v12  ;;  %v364_v16 = vld [vmem:[%s352_s22 + $0x30] sm:$0xff]  ;;  %v365_v17 = vld [vmem:[%s352_s22 + $0x38] sm:$0xff]  ;;  %v640_v41 = vld [vmem:[%s3405_s5 + $0x120] sm:$0xff] }
  0x14   : > { %2537 = vmatprep.mubr.msk.bf16.mxu0 %vm378_vm2, %v366_v10  ;;  %v369_v18 = vpack.c.bf16 %v365_v17, %v364_v16  ;;  %v2336_v43 = vcombine.high %v636_v40, %v640_v41  ;;  %v644_v44 = vld [vmem:[%s3405_s5 + $0x140] sm:$0xff]  ;;  %v2335_v46 = vcombine.low %v636_v40, %v640_v41  ;;  %v621_v8 = vld [vmem:[%s3405_s5 + $0x88] sm:$0xff] }
  0x15   : > { %2538 = vmatmul.mubr.msk.bf16.vlgmr.msra.gmra.mrb[0].mxu0 %vm378_vm2, %v367_v14  ;;  %2552 = vmatpush3.bf16.msra.mxu1 %v2591_v20  ;;  %v648_v45 = vld [vmem:[%s3405_s5 + $0x160] sm:$0xff]  ;;  %v625_v9 = vld [vmem:[%s3405_s5 + $0xa8] sm:$0xff] }
  0x16   : > { %2541 = vmatprep.mubr.msk.bf16.mxu0 %vm378_vm2, %v368_v15  ;;  %1103 = vmatprep.subr.bf16.mxu1 %v2306_v30  ;;  %v2344_v47 = vcombine.high %v644_v44, %v648_v45  ;;  %v2343_v48 = vcombine.low %v644_v44, %v648_v45  ;;  %v2289_v49 = vld [vmem:[%s3402_s2] ss:$0 sm:$0xff]  ;;  %v2313_v15 = vcombine.low %v613_v62, %v617_v63  ;;  %v629_v19 = vld [vmem:[%s3405_s5 + $0xc8] sm:$0xff] }
  0x17   : > { %1031 = vmatpush1.bf16.msra.mxu0 %v2303_v24  ;;  %v2322_v17 = vcombine.high %v621_v8, %v625_v9  ;;  %v633_v20 = vld [vmem:[%s3405_s5 + $0xe8] sm:$0xff]  ;;  %v2321_v24 = vcombine.low %v621_v8, %v625_v9  ;;  %v615_v8 = vld [vmem:[%s3405_s5 + $0x58] sm:$0xff] }
  0x18   : > { %1032 = vmatprep.subr.bf16.mxu0 %v2312_v31  ;;  %v2330_v23 = vcombine.high %v629_v19, %v633_v20  ;;  %v2329_v27 = vcombine.low %v629_v19, %v633_v20  ;;  %v649_v30 = vld [vmem:[%s3405_s5 + $0x168] sm:$0xff]  ;;  %v2337_v31 = vcombine.low %v637_v25, %v641_v26  ;;  %v619_v9 = vld [vmem:[%s3405_s5 + $0x78] sm:$0xff]  ;;  %v626_v20 = vld [vmem:[%s3405_s5 + $0xb0] sm:$0xff] }
  0x19   : > { %v661_v44 = vld [vmem:[%s3405_s5 + $0x1c8] sm:$0xff] }
  0x1b   : > { %1033 = vmatpush1.bf16.msra.mxu0 %v2311_v34  ;;  %v652_v34 = vld [vmem:[%s3405_s5 + $0x180] sm:$0xff] }
  0x1c   : > { %1034 = vmatprep.subr.bf16.mxu0 %v2320_v35  ;;  %v656_v35 = vld [vmem:[%s3405_s5 + $0x1a0] sm:$0xff] }
  0x1d   : > { %2542 = vmatmul.mubr.msk.bf16.gmra.mrb[4].mxu0 %vm378_vm2, %v369_v18  ;;  %v2352_v37 = vcombine.high %v652_v34, %v656_v35 }
  0x1f   : > { %1035 = vmatpush1.bf16.msra.mxu0 %v2319_v38  ;;  %v657_v38 = vld [vmem:[%s3405_s5 + $0x1a8] sm:$0xff] }
  0x20   : > { %1036 = vmatprep.subr.bf16.mxu0 %v2328_v39  ;;  %v2351_v39 = vcombine.low %v652_v34, %v656_v35  ;;  %v2353_v40 = vcombine.low %v653_v36, %v657_v38  ;;  %v2354_v41 = vcombine.high %v653_v36, %v657_v38  ;;  %v630_v34 = vld [vmem:[%s3405_s5 + $0xd0] sm:$0xff]  ;;  %v635_v38 = vld [vmem:[%s3405_s5 + $0xf8] sm:$0xff] }
  0x21   : > { %v634_v36 = vld [vmem:[%s3405_s5 + $0xf0] sm:$0xff] }
  0x23   : > { %1037 = vmatpush1.bf16.msra.mxu0 %v2327_v42  ;;  %v660_v42 = vld [vmem:[%s3405_s5 + $0x1c0] sm:$0xff] }
  0x24   : > { %1038 = vmatprep.subr.bf16.mxu0 %v2336_v43  ;;  %v664_v43 = vld [vmem:[%s3405_s5 + $0x1e0] sm:$0xff] }
  0x25   : > { %v2360_v45 = vcombine.high %v660_v42, %v664_v43 }
  0x27   : > { %1039 = vmatpush1.bf16.msra.mxu0 %v2335_v46  ;;  %v665_v46 = vld [vmem:[%s3405_s5 + $0x1e8] sm:$0xff] }
  0x28   : > { %1040 = vmatprep.subr.bf16.mxu0 %v2344_v47  ;;  %v2359_v47 = vcombine.low %v660_v42, %v664_v43 }
  0x2b   : > { %1041 = vmatpush1.bf16.msra.mxu0 %v2343_v48  ;;  %v2361_v48 = vcombine.low %v661_v44, %v665_v46 }
  0x2c   : > { %1042 = vmatprep.subr.bf16.mxu0 %v2352_v37  ;;  %v631_v37 = vld [vmem:[%s3405_s5 + $0xd8] sm:$0xff] }
  0x2f   : > { %1043 = vmatpush1.bf16.msra.mxu0 %v2351_v39 }
  0x30   : > { %1044 = vmatprep.subr.bf16.mxu0 %v2360_v45  ;;  %v2334_v45 = vcombine.high %v631_v37, %v635_v38 }
  0x33   : > { %1045 = vmatpush1.bf16.msra.mxu0 %v2359_v47  ;;  %v642_v47 = vld [vmem:[%s3405_s5 + $0x130] sm:$0xff] }
  0xe8   : > { %v2539_v50 = vpop.f32.mrb[0].mxu0 }
  0xe9   : > { %v441_v51 = vadd.f32 %v2539_v50, %v2289_v49  ;;  %v432_v52 = vpop.f32.mrb[1].mxu0  ;;  %v606_v50 = vld [vmem:[%s3405_s5 + $0x10] sm:$0xff] }
  0xea   : > { %v433_v53 = vadd.f32 %v2289_v49, %v432_v52  ;;  %v2540_v54 = vpop.f32.mrb[2].mxu0  ;;  %v607_v52 = vld [vmem:[%s3405_s5 + $0x18] sm:$0xff] }
  0xeb   : > { %v444_v55 = vadd.f32 %v2540_v54, %v2289_v49  ;;  %v435_v56 = vpop.f32.mrb[3].mxu0  ;;  %v465_v58 = vmax.f32 %v441_v51, 0.0  ;;  %v610_v51 = vld [vmem:[%s3405_s5 + $0x30] sm:$0xff]  ;;  %v611_v54 = vld [vmem:[%s3405_s5 + $0x38] sm:$0xff] }
  0xec   : > { %v436_v57 = vadd.f32 %v2289_v49, %v435_v56  ;;  %v463_v60 = vmax.f32 %v433_v53, 0.0  ;;  %v2308_v53 = vcombine.high %v606_v50, %v610_v51  ;;  %v2307_v56 = vcombine.low %v606_v50, %v610_v51 }
  0xed   : > { %v466_v59 = vmax.f32 %v444_v55, 0.0  ;;  %v2681_v55 = vmov 0   ;;  %v2331_v50 = vcombine.low %v630_v34, %v634_v36  ;;  %v2333_v51 = vcombine.low %v631_v37, %v635_v38  ;;  %v2613_v37 = vld [vmem:[%s3407_s7 + $0xe8] sm:$0xff]  }
  0xee   : > { %v464_v61 = vmax.f32 %v436_v57, 0.0  ;;  %1062 = vmatprep.mubr.bf16.mxu0 %v2681_v55  ;;  %v2309_v57 = vcombine.low %v607_v52, %v611_v54  ;;  %1176 = vmatprep.subr.bf16.mxu0 %v2308_v53  ;;  %v2614_v38 = vld [vmem:[%s3407_s7 + $0x28] sm:$0xff]  }
  0xef   : > { %v472_v0 = vpack.c.bf16 %v466_v59, %v465_v58  ;;  %v2310_v58 = vcombine.high %v607_v52, %v611_v54  ;;  %v2294_v59 = vld [vmem:[%s3404_s4] ss:$0 sm:$0xff]  ;;  %v646_v54 = vld [vmem:[%s3405_s5 + $0x150] sm:$0xff] }
  0xf0   : > { %v2543_v1 = vpop.f32.mrb[4].mxu0  ;;  %v471_v2 = vpack.c.bf16 %v464_v61, %v463_v60 }
  0xf1   : > { %v457_v3 = vadd.f32 %v2543_v1, %v2289_v49  ;;  %v448_v4 = vpop.f32.mrb[5].mxu0 }
  0xf2   : > { %v449_v6 = vadd.f32 %v2289_v49, %v448_v4  ;;  %2553 = vmatprep.mubr.msk.bf16.mxu1 %vm514_vm3, %v471_v2  ;;  %v2544_v7 = vpop.f32.mrb[6].mxu0  ;;  %v614_v4 = vld [vmem:[%s3405_s5 + $0x50] sm:$0xff] }
  0xf3   : > { %v469_v10 = vmax.f32 %v457_v3, 0.0  ;;  %v460_v11 = vadd.f32 %v2544_v7, %v2289_v49  ;;  %2554 = vmatmul.mubr.msk.bf16.vlgmr.msra.gmra.mrb[0].mxu1 %vm514_vm3, %v472_v0  ;;  %v451_v12 = vpop.f32.mrb[7].mxu0  ;;  %v618_v7 = vld [vmem:[%s3405_s5 + $0x70] sm:$0xff] }
  0xf4   : > { %v467_v13 = vmax.f32 %v449_v6, 0.0  ;;  %v452_v14 = vadd.f32 %v2289_v49, %v451_v12  ;;  %1104 = vmatpush1.bf16.msra.mxu1 %v2305_v29  ;;  %v645_v29 = vld [vmem:[%s3405_s5 + $0x148] sm:$0xff]  ;;  %v2362_v49 = vcombine.high %v661_v44, %v665_v46  ;;  %v2332_v44 = vcombine.high %v630_v34, %v634_v36  ;;  %v638_v46 = vld [vmem:[%s3405_s5 + $0x110] sm:$0xff]  ;;  %v2610_v34 = vld [vmem:[%s3407_s7 + $0x20] sm:$0xff]  }
  0xf5   : > { %v470_v16 = vmax.f32 %v460_v11, 0.0  ;;  %1105 = vmatprep.subr.bf16.mxu1 %v2314_v5  ;;  %v2346_v32 = vcombine.high %v645_v29, %v649_v30  ;;  %v2345_v33 = vcombine.low %v645_v29, %v649_v30  ;;  %v2317_v29 = vcombine.low %v615_v8, %v619_v9  ;;  %v2612_v36 = vld [vmem:[%s3407_s7 + $0x68] sm:$0xff]  }
  0xf6   : > { %v468_v18 = vmax.f32 %v452_v14, 0.0  ;;  %v2340_v52 = vcombine.high %v638_v46, %v642_v47 }
  0xf7   : > { %v474_v21 = vpack.c.bf16 %v470_v16, %v469_v10  ;;  %v2318_v16 = vcombine.high %v615_v8, %v619_v9  ;;  %v666_v8 = vld [vmem:[%s3405_s5 + $0x1f0] sm:$0xff]  ;;  %v663_v9 = vld [vmem:[%s3405_s5 + $0x1d8] sm:$0xff] }
  0xf8   : > { %v473_v22 = vpack.c.bf16 %v468_v18, %v467_v13  ;;  %1106 = vmatpush1.bf16.msra.mxu1 %v2313_v15  ;;  %v2316_v15 = vcombine.high %v614_v4, %v618_v7 }
  0xf9   : > { %1107 = vmatprep.subr.bf16.mxu1 %v2322_v17  ;;  %v622_v17 = vld [vmem:[%s3405_s5 + $0x90] sm:$0xff] }
  0xfa   : > { %2557 = vmatprep.mubr.msk.bf16.mxu1 %vm514_vm3, %v473_v22  ;;  %v627_v22 = vld [vmem:[%s3405_s5 + $0xb8] sm:$0xff] }
  0xfb   : > { %2558 = vmatmul.mubr.msk.bf16.gmra.mrb[4].mxu1 %vm514_vm3, %v474_v21  ;;  %v623_v21 = vld [vmem:[%s3405_s5 + $0x98] sm:$0xff] }
  0xfc   : > { %1108 = vmatpush1.bf16.msra.mxu1 %v2321_v24  ;;  %1135 = vmatprep.mubr.bf16.mxu1 %v2681_v55  ;;  %v2325_v42 = vcombine.low %v623_v21, %v627_v22 }
  0xfd   : > { %1109 = vmatprep.subr.bf16.mxu1 %v2330_v23 }
 0x100   : > { %1110 = vmatpush1.bf16.msra.mxu1 %v2329_v27 }
 0x101   : > { %1111 = vmatprep.subr.bf16.mxu1 %v2338_v28  ;;  %v2315_v28 = vcombine.low %v614_v4, %v618_v7  ;;  %v662_v7 = vld [vmem:[%s3405_s5 + $0x1d0] sm:$0xff] }
 0x104   : > { %1112 = vmatpush1.bf16.msra.mxu1 %v2337_v31 }
 0x105   : > { %1113 = vmatprep.subr.bf16.mxu1 %v2346_v32  ;;  %v2324_v32 = vcombine.high %v622_v17, %v626_v20 }
 0x108   : > { %1114 = vmatpush1.bf16.msra.mxu1 %v2345_v33  ;;  %v2326_v33 = vcombine.high %v623_v21, %v627_v22  ;;  %v2597_v21 = vld [vmem:[%s3407_s7 + $0xc8] sm:$0xff]  }
 0x109   : > { %1115 = vmatprep.subr.bf16.mxu1 %v2354_v41  ;;  %v2323_v41 = vcombine.low %v622_v17, %v626_v20  ;;  %v2363_v17 = vcombine.low %v662_v7, %v666_v8  ;;  %v2596_v20 = vld [vmem:[%s3407_s7 + $0x48] sm:$0xff]  }
 0x10a   : > { %v2598_v22 = vld [vmem:[%s3407_s7 + $0x8] sm:$0xff]  }
 0x10c   : > { %1116 = vmatpush1.bf16.msra.mxu1 %v2353_v40 }
 0x10d   : > { %1117 = vmatprep.subr.bf16.mxu1 %v2362_v49  ;;  %v643_v49 = vld [vmem:[%s3405_s5 + $0x138] sm:$0xff] }
 0x110   : > { %1118 = vmatpush1.bf16.msra.mxu1 %v2361_v48  ;;  %v639_v48 = vld [vmem:[%s3405_s5 + $0x118] sm:$0xff] }
 0x111   : > { %1249 = vmatprep.subr.bf16.mxu1 %v2310_v58  ;;  %v2342_v53 = vcombine.high %v639_v48, %v643_v49  ;;  %v651_v58 = vld [vmem:[%s3405_s5 + $0x178] sm:$0xff] }
 0x1c6   : > { %v2555_v60 = vpop.f32.mrb[0].mxu1 }
 0x1c7   : > { %v570_v61 = vadd.f32 %v2555_v60, %v2294_v59  ;;  %v561_v62 = vpop.f32.mrb[1].mxu1  ;;  %v2341_v60 = vcombine.low %v639_v48, %v643_v49  ;;  %v2624_v48 = vld [vmem:[%s3407_s7 + $0x140] sm:$0xff]  }
 0x1c8   : > { %v562_v63 = vadd.f32 %v2294_v59, %v561_v62  ;;  %v2556_v0 = vpop.f32.mrb[2].mxu1  ;;  %v2625_v49 = vld [vmem:[%s3407_s7 + $0x1c0] sm:$0xff]  }
 0x1c9   : > { %v573_v1 = vadd.f32 %v2556_v0, %v2294_v59  ;;  %v564_v2 = vpop.f32.mrb[3].mxu1  ;;  %v594_v5 = vmax.f32 %v570_v61, 0.0  ;;  %v658_v0 = vld [vmem:[%s3405_s5 + $0x1b0] sm:$0xff] }
 0x1ca   : > { %v565_v3 = vadd.f32 %v2294_v59, %v564_v2  ;;  %v592_v10 = vmax.f32 %v562_v63, 0.0  ;;  %v654_v63 = vld [vmem:[%s3405_s5 + $0x190] sm:$0xff]  ;;  %v659_v2 = vld [vmem:[%s3405_s5 + $0x1b8] sm:$0xff] }
 0x1cb   : > { %v595_v6 = vmax.f32 %v573_v1, 0.0  ;;  %v655_v1 = vld [vmem:[%s3405_s5 + $0x198] sm:$0xff] }
 0x1cc   : > { %v593_v11 = vmax.f32 %v565_v3, 0.0 }
 0x1cd   : > { %v2919_v12 = vpack.c.bf16 %v595_v6, %v594_v5  ;;  %v2356_v5 = vcombine.high %v654_v63, %v658_v0  ;;  %v2358_v6 = vcombine.high %v655_v1, %v659_v2 }
 0x1ce   : > { %v2921_v13 = vpack.c.bf16 %v593_v11, %v592_v10  ;;  %v2559_v14 = vpop.f32.mrb[4].mxu1  ;;  %v667_v10 = vld [vmem:[%s3405_s5 + $0x1f8] sm:$0xff]  ;;  %v2355_v11 = vcombine.low %v654_v63, %v658_v0 }
 0x1cf   : > { %v586_v18 = vadd.f32 %v2559_v14, %v2294_v59  ;;  %v577_v19 = vpop.f32.mrb[5].mxu1  ;;  %v2357_v14 = vcombine.low %v655_v1, %v659_v2 }
 0x1d0   : > { %v578_v24 = vadd.f32 %v2294_v59, %v577_v19  ;;  %1063 = vmatmul.mubr.bf16.vlgmr.msra.gmra.mrb[8].mxu0 %v2921_v13  ;;  %1136 = vmatmul.mubr.bf16.vlgmr.msra.gmra.mrb[8].mxu1 %v2921_v13  ;;  %v2560_v23 = vpop.f32.mrb[6].mxu1  ;;  %v2594_v19 = vld [vmem:[%s3407_s7] sm:$0xff]  }
 0x1d1   : > { %v598_v25 = vmax.f32 %v586_v18, 0.0  ;;  %1177 = vmatpush1.bf16.msra.mxu0 %v2307_v56  ;;  %1250 = vmatpush1.bf16.msra.mxu1 %v2309_v57  ;;  %v589_v26 = vadd.f32 %v2560_v23, %v2294_v59  ;;  %v580_v27 = vpop.f32.mrb[7].mxu1  ;;  %v650_v56 = vld [vmem:[%s3405_s5 + $0x170] sm:$0xff]  ;;  %v647_v57 = vld [vmem:[%s3405_s5 + $0x158] sm:$0xff]  ;;  %v2365_v18 = vcombine.low %v663_v9, %v667_v10 }
 0x1d2   : > { %v596_v30 = vmax.f32 %v578_v24, 0.0  ;;  %v581_v31 = vadd.f32 %v2294_v59, %v580_v27  ;;  %1178 = vmatprep.subr.bf16.mxu0 %v2316_v15  ;;  %1251 = vmatprep.subr.bf16.mxu1 %v2318_v16  ;;  %v2339_v59 = vcombine.low %v638_v46, %v642_v47  ;;  %v2348_v61 = vcombine.high %v646_v54, %v650_v56  ;;  %v2599_v24 = vld [vmem:[%s3407_s7 + $0x88] sm:$0xff]   ;;  %v2600_v23 = vld [vmem:[%s3407_s7 + $0x50] sm:$0xff]   ;;  %v2622_v46 = vld [vmem:[%s3407_s7 + $0x38] sm:$0xff]  }
 0x1d3   : > { %v599_v35 = vmax.f32 %v589_v26, 0.0  ;;  %1072 = vmatprep.mubr.bf16.mxu0 %v2681_v55  ;;  %1145 = vmatprep.mubr.bf16.mxu1 %v2681_v55  ;;  %v2350_v62 = vcombine.high %v647_v57, %v651_v58  ;;  %v2347_v3 = vcombine.low %v646_v54, %v650_v56  ;;  %v2349_v4 = vcombine.low %v647_v57, %v651_v58  ;;  %v2602_v26 = vld [vmem:[%s3407_s7 + $0x10] sm:$0xff]   ;;  %v2623_v47 = vld [vmem:[%s3407_s7 + $0xb8] sm:$0xff]   ;;  %v3138_v54 = vld [vmem:[%s3406_s6] sm:$0xff] }
 0x1d4   : > { %v597_v39 = vmax.f32 %v581_v31, 0.0  ;;  %v2364_v15 = vcombine.high %v662_v7, %v666_v8  ;;  %v2366_v16 = vcombine.high %v663_v9, %v667_v10  ;;  %v2603_v27 = vld [vmem:[%s3407_s7 + $0x90] sm:$0xff]   ;;  %v2607_v31 = vld [vmem:[%s3407_s7 + $0x98] sm:$0xff]  }
 0x1d5   : > { %v2951_v40 = vpack.c.bf16 %v599_v35, %v598_v25  ;;  %1179 = vmatpush1.bf16.msra.mxu0 %v2315_v28  ;;  %1252 = vmatpush1.bf16.msra.mxu1 %v2317_v29  ;;  %v2601_v25 = vld [vmem:[%s3407_s7 + $0xd0] sm:$0xff]   ;;  %v2604_v28 = vld [vmem:[%s3407_s7 + $0x58] sm:$0xff]   ;;  %v2611_v35 = vld [vmem:[%s3407_s7 + $0xa0] sm:$0xff]  }
 0x1d6   : > { %v2953_v43 = vpack.c.bf16 %v597_v39, %v596_v30  ;;  %1180 = vmatprep.subr.bf16.mxu0 %v2324_v32  ;;  %1253 = vmatprep.subr.bf16.mxu1 %v2326_v33  ;;  %v2605_v29 = vld [vmem:[%s3407_s7 + $0xd8] sm:$0xff]   ;;  %v2608_v32 = vld [vmem:[%s3407_s7 + $0x60] sm:$0xff]   ;;  %v2615_v39 = vld [vmem:[%s3407_s7 + $0xa8] sm:$0xff]  }
 0x1d7   : > { %v2606_v30 = vld [vmem:[%s3407_s7 + $0x18] sm:$0xff]   ;;  %v2609_v33 = vld [vmem:[%s3407_s7 + $0xe0] sm:$0xff]  }
 0x1d8   : > { %1073 = vmatmul.mubr.bf16.gmra.mrb[12].mxu0 %v2919_v12  ;;  %1146 = vmatmul.mubr.bf16.gmra.mrb[12].mxu1 %v2919_v12 }
 0x1d9   : > { %1181 = vmatpush1.bf16.msra.mxu0 %v2323_v41  ;;  %1254 = vmatpush1.bf16.msra.mxu1 %v2325_v42  ;;  %v2617_v41 = vld [vmem:[%s3407_s7 + $0xf0] sm:$0xff]  }
 0x1da   : > { %1182 = vmatprep.subr.bf16.mxu0 %v2332_v44  ;;  %1255 = vmatprep.subr.bf16.mxu1 %v2334_v45  ;;  %v2618_v42 = vld [vmem:[%s3407_s7 + $0x30] sm:$0xff]   ;;  %v2620_v44 = vld [vmem:[%s3407_s7 + $0x78] sm:$0xff]  }
 0x1db   : > { %1082 = vmatprep.mubr.bf16.mxu0 %v2681_v55  ;;  %1155 = vmatprep.mubr.bf16.mxu1 %v2681_v55  ;;  %v2621_v45 = vld [vmem:[%s3407_s7 + $0xf8] sm:$0xff]  }
 0x1dd   : > { %1183 = vmatpush1.bf16.msra.mxu0 %v2331_v50  ;;  %1256 = vmatpush1.bf16.msra.mxu1 %v2333_v51  ;;  %v670_v50 = vlaneseq }
 0x1de   : > { %1184 = vmatprep.subr.bf16.mxu0 %v2340_v52  ;;  %1257 = vmatprep.subr.bf16.mxu1 %v2342_v53 }
 0x1df   : > { %v3131_v51 = vshrl.u32 %v670_v50, 7 }
 0x1e0   : > { %1083 = vmatmul.mubr.bf16.gmra.mrb[16].mxu0 %v2953_v43  ;;  %1156 = vmatmul.mubr.bf16.gmra.mrb[16].mxu1 %v2953_v43 }
 0x1e1   : > { %1185 = vmatpush1.bf16.msra.mxu0 %v2339_v59  ;;  %1258 = vmatpush1.bf16.msra.mxu1 %v2341_v60  ;;  %v672_v52 = vsub.s32 0, %v3131_v51  ;;  %v680_v53 = vsub.s32 2, %v3131_v51  ;;  %v676_v56 = vsub.s32 1, %v3131_v51  ;;  %v684_v57 = vsub.s32 3, %v3131_v51 }
 0x1e2   : > { %1186 = vmatprep.subr.bf16.mxu0 %v2348_v61  ;;  %1259 = vmatprep.subr.bf16.mxu1 %v2350_v62 }
 0x1e3   : > { %1092 = vmatprep.mubr.bf16.mxu0 %v2681_v55  ;;  %1165 = vmatprep.mubr.bf16.mxu1 %v2681_v55  ;;  %v3145_v58 = vrot.slane %v3138_v54, %v672_v52  ;;  %v3150_v59 = vrot.slane %v3138_v54, %v680_v53  ;;  %v3155_v62 = vrot.slane %v3138_v54, %v676_v56 }
 0x1e4   : > { %v3160_v63 = vrot.slane %v3138_v54, %v684_v57 }
 0x1e5   : > { %1187 = vmatpush1.bf16.msra.mxu0 %v2347_v3  ;;  %1260 = vmatpush1.bf16.msra.mxu1 %v2349_v4 }
 0x1e6   : > { %1188 = vmatprep.subr.bf16.mxu0 %v2356_v5  ;;  %1261 = vmatprep.subr.bf16.mxu1 %v2358_v6 }
 0x1e8   : > { %1093 = vmatmul.mubr.bf16.gmra.mrb[20].mxu0 %v2951_v40  ;;  %1166 = vmatmul.mubr.bf16.gmra.mrb[20].mxu1 %v2951_v40 }
 0x1e9   : > { %1189 = vmatpush1.bf16.msra.mxu0 %v2355_v11  ;;  %1262 = vmatpush1.bf16.msra.mxu1 %v2357_v14 }
 0x1ea   : > { %1190 = vmatprep.subr.bf16.mxu0 %v2364_v15  ;;  %1263 = vmatprep.subr.bf16.mxu1 %v2366_v16 }
 0x1eb   : > { %1208 = vmatprep.mubr.bf16.mxu0 %v2681_v55  ;;  %1281 = vmatprep.mubr.bf16.mxu1 %v2681_v55 }
 0x1ed   : > { %1191 = vmatpush1.bf16.msra.mxu0 %v2363_v17  ;;  %1264 = vmatpush1.bf16.msra.mxu1 %v2365_v18 }
 0x1f0   : > { %1209 = vmatmul.mubr.bf16.vlgmr.msra.gmra.mrb[24].mxu0 %v2921_v13  ;;  %1282 = vmatmul.mubr.bf16.vlgmr.msra.gmra.mrb[24].mxu1 %v2921_v13  ;;  %v2593_v13 = vld [vmem:[%s3407_s7 + $0xc0] sm:$0xff]  }
 0x1f1   : > { %1218 = vmatprep.mubr.bf16.mxu0 %v2681_v55  ;;  %1291 = vmatprep.mubr.bf16.mxu1 %v2681_v55 }
 0x1f2   : > { %2469 = vmatprep.subr.bf16.mxu1 %v2593_v13 }
 0x1f8   : > { %1219 = vmatmul.mubr.bf16.gmra.mrb[28].mxu0 %v2919_v12  ;;  %1292 = vmatmul.mubr.bf16.gmra.mrb[28].mxu1 %v2919_v12  ;;  %v2592_v12 = vld [vmem:[%s3407_s7 + $0x40] sm:$0xff]  }
 0x1f9   : > { %1228 = vmatprep.mubr.bf16.mxu0 %v2681_v55  ;;  %1301 = vmatprep.mubr.bf16.mxu1 %v2681_v55 }
 0x1fa   : > { %2447 = vmatprep.subr.bf16.mxu0 %v2592_v12 }
 0x1fb   : > { %2448 = vmatpush3.bf16.msra.mxu0 %v2594_v19 }
 0x1fc   : > { %2449 = vmatprep.subr.bf16.mxu0 %v2596_v20 }
 0x1ff   : > { %2450 = vmatpush3.bf16.msra.mxu0 %v2598_v22 }
 0x200   : > { %1229 = vmatmul.mubr.bf16.gmra.mrb[32].mxu0 %v2953_v43  ;;  %1302 = vmatmul.mubr.bf16.gmra.mrb[32].mxu1 %v2953_v43  ;;  %v2619_v43 = vld [vmem:[%s3407_s7 + $0xb0] sm:$0xff]  }
 0x201   : > { %1238 = vmatprep.mubr.bf16.mxu0 %v2681_v55  ;;  %1311 = vmatprep.mubr.bf16.mxu1 %v2681_v55  ;;  %v2595_v55 = vld [vmem:[%s3407_s7 + $0x80] sm:$0xff]  }
 0x202   : > { %2470 = vmatpush3.bf16.msra.mxu1 %v2595_v55  ;;  %2451 = vmatprep.subr.bf16.mxu0 %v2600_v23 }
 0x203   : > { %2471 = vmatprep.subr.bf16.mxu1 %v2597_v21  ;;  %2452 = vmatpush3.bf16.msra.mxu0 %v2602_v26 }
 0x204   : > { %2453 = vmatprep.subr.bf16.mxu0 %v2604_v28 }
 0x206   : > { %2472 = vmatpush3.bf16.msra.mxu1 %v2599_v24 }
 0x207   : > { %2473 = vmatprep.subr.bf16.mxu1 %v2601_v25  ;;  %2454 = vmatpush3.bf16.msra.mxu0 %v2606_v30 }
 0x208   : > { %1239 = vmatmul.mubr.bf16.gmra.mrb[36].mxu0 %v2951_v40  ;;  %1312 = vmatmul.mubr.bf16.gmra.mrb[36].mxu1 %v2951_v40  ;;  %v2616_v40 = vld [vmem:[%s3407_s7 + $0x70] sm:$0xff]  }
 0x209   : > { %2455 = vmatprep.subr.bf16.mxu0 %v2608_v32 }
 0x20a   : > { %2474 = vmatpush3.bf16.msra.mxu1 %v2603_v27 }
 0x20b   : > { %2475 = vmatprep.subr.bf16.mxu1 %v2605_v29  ;;  %2456 = vmatpush3.bf16.msra.mxu0 %v2610_v34 }
 0x20c   : > { %2457 = vmatprep.subr.bf16.mxu0 %v2612_v36 }
 0x20e   : > { %2476 = vmatpush3.bf16.msra.mxu1 %v2607_v31 }
 0x20f   : > { %2477 = vmatprep.subr.bf16.mxu1 %v2609_v33  ;;  %2458 = vmatpush3.bf16.msra.mxu0 %v2614_v38 }
 0x210   : > { %2459 = vmatprep.subr.bf16.mxu0 %v2616_v40 }
 0x212   : > { %2478 = vmatpush3.bf16.msra.mxu1 %v2611_v35 }
 0x213   : > { %2479 = vmatprep.subr.bf16.mxu1 %v2613_v37  ;;  %2460 = vmatpush3.bf16.msra.mxu0 %v2618_v42 }
 0x214   : > { %2461 = vmatprep.subr.bf16.mxu0 %v2620_v44 }
 0x216   : > { %2480 = vmatpush3.bf16.msra.mxu1 %v2615_v39 }
 0x217   : > { %2481 = vmatprep.subr.bf16.mxu1 %v2617_v41  ;;  %2462 = vmatpush3.bf16.msra.mxu0 %v2622_v46 }
 0x218   : > { %2491 = vmatprep.subr.bf16.mxu0 %v2624_v48 }
 0x21a   : > { %2482 = vmatpush3.bf16.msra.mxu1 %v2619_v43 }
 0x21b   : > { %2483 = vmatprep.subr.bf16.mxu1 %v2621_v45 }
 0x21e   : > { %2484 = vmatpush3.bf16.msra.mxu1 %v2623_v47 }
 0x21f   : > { %2513 = vmatprep.subr.bf16.mxu1 %v2625_v49 }
 0x2a3   : > { %v1064_v60 = vpop.f32.mrb[8].mxu0  ;;  %v1137_v61 = vpop.f32.mrb[8].mxu1 }
 0x2a4   : > { %v1066_v0 = vpop.f32.mrb[9].mxu0  ;;  %v1139_v1 = vpop.f32.mrb[9].mxu1  ;;  %v1065_v4 = vadd.f32 %v1064_v60, %v3145_v58  ;;  %v1138_v5 = vadd.f32 %v1137_v61, %v3150_v59 }
 0x2a5   : > { %v1068_v2 = vpop.f32.mrb[10].mxu0  ;;  %v1141_v3 = vpop.f32.mrb[10].mxu1  ;;  %v1067_v10 = vadd.f32 %v1066_v0, %v3155_v62  ;;  %v1140_v11 = vadd.f32 %v1139_v1, %v3160_v63 }
 0x2a6   : > { %v1069_v6 = vadd.f32 %v1068_v2, %v3145_v58  ;;  %v1142_v7 = vadd.f32 %v1141_v3, %v3150_v59  ;;  %v1070_v8 = vpop.f32.mrb[11].mxu0  ;;  %v1143_v9 = vpop.f32.mrb[11].mxu1 }
 0x2a7   : > { %v1071_v14 = vadd.f32 %v1070_v8, %v3155_v62  ;;  %v1144_v15 = vadd.f32 %v1143_v9, %v3160_v63 }
 0x2a8   : > { %v1322_v16 = vmax.f32 %v1065_v4, %v1069_v6  ;;  %v1348_v17 = vmax.f32 %v1138_v5, %v1142_v7 }
 0x2a9   : > { %v1335_v18 = vmax.f32 %v1067_v10, %v1071_v14  ;;  %v1361_v12 = vmax.f32 %v1140_v11, %v1144_v15 }
 0x2ab   : > { %v1074_v13 = vpop.f32.mrb[12].mxu0  ;;  %v1147_v19 = vpop.f32.mrb[12].mxu1 }
 0x2ac   : > { %v1075_v55 = vadd.f32 %v1074_v13, %v3145_v58  ;;  %v1148_v20 = vadd.f32 %v1147_v19, %v3150_v59  ;;  %v1076_v21 = vpop.f32.mrb[13].mxu0  ;;  %v1149_v22 = vpop.f32.mrb[13].mxu1  ;;  %v696_v19 = vsub.s32 6, %v3131_v51 }
 0x2ad   : > { %v1077_v24 = vadd.f32 %v1076_v21, %v3155_v62  ;;  %v1150_v23 = vadd.f32 %v1149_v22, %v3160_v63  ;;  %v1078_v25 = vpop.f32.mrb[14].mxu0  ;;  %v1151_v26 = vpop.f32.mrb[14].mxu1 }
 0x2ae   : > { %v1323_v27 = vmax.f32 %v1322_v16, %v1075_v55  ;;  %v1349_v28 = vmax.f32 %v1348_v17, %v1148_v20  ;;  %v1079_v29 = vadd.f32 %v1078_v25, %v3145_v58  ;;  %v1152_v30 = vadd.f32 %v1151_v26, %v3150_v59  ;;  %v1080_v31 = vpop.f32.mrb[15].mxu0  ;;  %v1153_v32 = vpop.f32.mrb[15].mxu1 }
 0x2af   : > { %v1336_v33 = vmax.f32 %v1335_v18, %v1077_v24  ;;  %v1362_v34 = vmax.f32 %v1361_v12, %v1150_v23  ;;  %v1081_v35 = vadd.f32 %v1080_v31, %v3155_v62  ;;  %v1154_v36 = vadd.f32 %v1153_v32, %v3160_v63 }
 0x2b0   : > { %v1324_v37 = vmax.f32 %v1323_v27, %v1079_v29  ;;  %v1350_v38 = vmax.f32 %v1349_v28, %v1152_v30  ;;  %v688_v16 = vsub.s32 4, %v3131_v51  ;;  %v692_v55 = vsub.s32 5, %v3131_v51 }
 0x2b1   : > { %v1337_v39 = vmax.f32 %v1336_v33, %v1081_v35  ;;  %v1363_v40 = vmax.f32 %v1362_v34, %v1154_v36  ;;  %v2682_v23 = vmov 1966171168   ;;  %v700_v26 = vsub.s32 7, %v3131_v51 }
 0x2b2   : > { %v1445_v25 = vunpack.c.l.s4 %v2682_v23 }
 0x2b3   : > { %v1084_v41 = vpop.f32.mrb[16].mxu0  ;;  %v1157_v42 = vpop.f32.mrb[16].mxu1 }
 0x2b4   : > { %v1085_v43 = vadd.f32 %v1084_v41, %v3145_v58  ;;  %v1158_v44 = vadd.f32 %v1157_v42, %v3150_v59  ;;  %v1086_v45 = vpop.f32.mrb[17].mxu0  ;;  %v1159_v46 = vpop.f32.mrb[17].mxu1 }
 0x2b5   : > { %v1087_v47 = vadd.f32 %v1086_v45, %v3155_v62  ;;  %v1160_v48 = vadd.f32 %v1159_v46, %v3160_v63  ;;  %v1088_v49 = vpop.f32.mrb[18].mxu0  ;;  %v1161_v50 = vpop.f32.mrb[18].mxu1 }
 0x2b6   : > { %v1325_v60 = vmax.f32 %v1324_v37, %v1085_v43  ;;  %v1351_v61 = vmax.f32 %v1350_v38, %v1158_v44  ;;  %v1089_v0 = vadd.f32 %v1088_v49, %v3145_v58  ;;  %v1162_v1 = vadd.f32 %v1161_v50, %v3150_v59  ;;  %v1090_v2 = vpop.f32.mrb[19].mxu0  ;;  %v1163_v3 = vpop.f32.mrb[19].mxu1 }
 0x2b7   : > { %v1338_v4 = vmax.f32 %v1337_v39, %v1087_v47  ;;  %v1364_v5 = vmax.f32 %v1363_v40, %v1160_v48  ;;  %v1091_v6 = vadd.f32 %v1090_v2, %v3155_v62  ;;  %v1164_v7 = vadd.f32 %v1163_v3, %v3160_v63 }
 0x2b8   : > { %v1326_v8 = vmax.f32 %v1325_v60, %v1089_v0  ;;  %v1352_v9 = vmax.f32 %v1351_v61, %v1162_v1  ;;  %v3201_v39 = vrot.slane %v3138_v54, %v688_v16  ;;  %v1446_v44 = vunpack.c.0.s8 %v1445_v25 }
 0x2b9   : > { %v1339_v10 = vmax.f32 %v1338_v4, %v1091_v6  ;;  %v1365_v11 = vmax.f32 %v1364_v5, %v1164_v7 }
 0x2bb   : > { %v1094_v14 = vpop.f32.mrb[20].mxu0  ;;  %v1167_v15 = vpop.f32.mrb[20].mxu1 }
 0x2bc   : > { %v1095_v17 = vadd.f32 %v1094_v14, %v3145_v58  ;;  %v1168_v18 = vadd.f32 %v1167_v15, %v3150_v59  ;;  %v1096_v12 = vpop.f32.mrb[21].mxu0  ;;  %v1169_v13 = vpop.f32.mrb[21].mxu1 }
 0x2bd   : > { %v1097_v20 = vadd.f32 %v1096_v12, %v3155_v62  ;;  %v1170_v21 = vadd.f32 %v1169_v13, %v3160_v63  ;;  %v1098_v22 = vpop.f32.mrb[22].mxu0  ;;  %v1171_v24 = vpop.f32.mrb[22].mxu1 }
 0x2be   : > { %v1327_v27 = vmax.f32 %v1326_v8, %v1095_v17  ;;  %v1353_v28 = vmax.f32 %v1352_v9, %v1168_v18  ;;  %v1099_v29 = vadd.f32 %v1098_v22, %v3145_v58  ;;  %v1172_v30 = vadd.f32 %v1171_v24, %v3150_v59  ;;  %v1100_v31 = vpop.f32.mrb[23].mxu0  ;;  %v1173_v32 = vpop.f32.mrb[23].mxu1 }
 0x2bf   : > { %v1340_v33 = vmax.f32 %v1339_v10, %v1097_v20  ;;  %v1366_v34 = vmax.f32 %v1365_v11, %v1170_v21  ;;  %v1101_v35 = vadd.f32 %v1100_v31, %v3155_v62  ;;  %v1174_v36 = vadd.f32 %v1173_v32, %v3160_v63 }
 0x2c0   : > { %v1328_v37 = vmax.f32 %v1327_v27, %v1099_v29  ;;  %v1354_v38 = vmax.f32 %v1353_v28, %v1172_v30  ;;  %v3206_v58 = vrot.slane %v3138_v54, %v696_v19  ;;  %v3211_v62 = vrot.slane %v3138_v54, %v692_v55 }
 0x2c1   : > { %v1341_v59 = vmax.f32 %v1340_v33, %v1101_v35  ;;  %v1367_v40 = vmax.f32 %v1366_v34, %v1174_v36  ;;  %v3216_v63 = vrot.slane %v3138_v54, %v700_v26  ;;  %v3227_v30 = vsub.s32 %v1446_v44, %v3131_v51 }
 0x2c2   : > { %v1329_v41 = vrot.slane %v1328_v37, 4  ;;  %v1355_v42 = vrot.slane %v1354_v38, 4 }
 0x2c3   : > { %v1342_v43 = vrot.slane %v1341_v59, 4  ;;  %v1368_v45 = vrot.slane %v1367_v40, 4  ;;  %v1210_v46 = vpop.f32.mrb[24].mxu0  ;;  %v1283_v47 = vpop.f32.mrb[24].mxu1 }
 0x2c4   : > { %v1330_v48 = vmax.f32 %v1328_v37, %v1329_v41  ;;  %v1356_v49 = vmax.f32 %v1354_v38, %v1355_v42  ;;  %v1211_v50 = vadd.f32 %v1210_v46, %v3201_v39  ;;  %v1284_v60 = vadd.f32 %v1283_v47, %v3206_v58  ;;  %v1212_v61 = vpop.f32.mrb[25].mxu0  ;;  %v1285_v0 = vpop.f32.mrb[25].mxu1 }
 0x2c5   : > { %v1343_v1 = vmax.f32 %v1341_v59, %v1342_v43  ;;  %v1369_v2 = vmax.f32 %v1367_v40, %v1368_v45  ;;  %v1213_v54 = vadd.f32 %v1212_v61, %v3211_v62  ;;  %v1286_v3 = vadd.f32 %v1285_v0, %v3216_v63  ;;  %v1214_v4 = vpop.f32.mrb[26].mxu0  ;;  %v1287_v5 = vpop.f32.mrb[26].mxu1 }
 0x2c6   : > { %v1331_v6 = vrot.slane %v1330_v48, 2  ;;  %v1357_v7 = vrot.slane %v1356_v49, 2  ;;  %v1215_v8 = vadd.f32 %v1214_v4, %v3201_v39  ;;  %v1288_v9 = vadd.f32 %v1287_v5, %v3206_v58  ;;  %v1216_v10 = vpop.f32.mrb[27].mxu0  ;;  %v1289_v11 = vpop.f32.mrb[27].mxu1 }
 0x2c7   : > { %v1344_v14 = vrot.slane %v1343_v1, 2  ;;  %v1370_v15 = vrot.slane %v1369_v2, 2  ;;  %v1217_v17 = vadd.f32 %v1216_v10, %v3211_v62  ;;  %v1290_v18 = vadd.f32 %v1289_v11, %v3216_v63 }
 0x2c8   : > { %v1332_v12 = vmax.f32 %v1330_v48, %v1331_v6  ;;  %v1358_v13 = vmax.f32 %v1356_v49, %v1357_v7  ;;  %v1374_v20 = vmax.f32 %v1211_v50, %v1215_v8  ;;  %v1400_v21 = vmax.f32 %v1284_v60, %v1288_v9 }
 0x2c9   : > { %v1345_v22 = vmax.f32 %v1343_v1, %v1344_v14  ;;  %v1371_v24 = vmax.f32 %v1369_v2, %v1370_v15  ;;  %v1387_v23 = vmax.f32 %v1213_v54, %v1217_v17  ;;  %v1413_v25 = vmax.f32 %v1286_v3, %v1290_v18 }
 0x2ca   : > { %v1333_v27 = vrot.slane %v1332_v12, 1  ;;  %v1359_v28 = vrot.slane %v1358_v13, 1 }
 0x2cb   : > { %v1346_v29 = vrot.slane %v1345_v22, 1  ;;  %v1372_v31 = vrot.slane %v1371_v24, 1  ;;  %v1220_v32 = vpop.f32.mrb[28].mxu0  ;;  %v1293_v33 = vpop.f32.mrb[28].mxu1 }
 0x2cc   : > { %v1334_v34 = vmax.f32 %v1332_v12, %v1333_v27  ;;  %v1360_v35 = vmax.f32 %v1358_v13, %v1359_v28  ;;  %v1221_v36 = vadd.f32 %v1220_v32, %v3201_v39  ;;  %v1294_v37 = vadd.f32 %v1293_v33, %v3206_v58  ;;  %v1222_v38 = vpop.f32.mrb[29].mxu0  ;;  %v1295_v59 = vpop.f32.mrb[29].mxu1 }
 0x2cd   : > { %v1347_v40 = vmax.f32 %v1345_v22, %v1346_v29  ;;  %v1373_v41 = vmax.f32 %v1371_v24, %v1372_v31  ;;  %v1223_v42 = vadd.f32 %v1222_v38, %v3211_v62  ;;  %v1296_v43 = vadd.f32 %v1295_v59, %v3216_v63  ;;  %v1224_v45 = vpop.f32.mrb[30].mxu0  ;;  %v1297_v44 = vpop.f32.mrb[30].mxu1 }
 0x2ce   : > { %v1375_v46 = vmax.f32 %v1374_v20, %v1221_v36  ;;  %v1401_v47 = vmax.f32 %v1400_v21, %v1294_v37  ;;  %v1225_v48 = vadd.f32 %v1224_v45, %v3201_v39  ;;  %v1298_v49 = vadd.f32 %v1297_v44, %v3206_v58  ;;  %v1226_v50 = vpop.f32.mrb[31].mxu0  ;;  %v1299_v60 = vpop.f32.mrb[31].mxu1 }
 0x2cf   : > { %v1440_v61 = vcombine.low %v1334_v34, %v1347_v40  ;;  %v1441_v0 = vcombine.low %v1360_v35, %v1373_v41  ;;  %v1388_v1 = vmax.f32 %v1387_v23, %v1223_v42  ;;  %v1414_v2 = vmax.f32 %v1413_v25, %v1296_v43 }
 0x2d0   : > { %v1376_v54 = vmax.f32 %v1375_v46, %v1225_v48  ;;  %v1402_v3 = vmax.f32 %v1401_v47, %v1298_v49  ;;  %v1227_v4 = vadd.f32 %v1226_v50, %v3211_v62  ;;  %v1300_v5 = vadd.f32 %v1299_v60, %v3216_v63 }
 0x2d1   : > { %v3238_v6 = vrot.slane %v1440_v61, %v3227_v30  ;;  %v3241_v7 = vrot.slane %v1441_v0, %v3227_v30 }
 0x2d2   : > { %v1389_v8 = vmax.f32 %v1388_v1, %v1227_v4  ;;  %v1415_v9 = vmax.f32 %v1414_v2, %v1300_v5 }
 0x2d3   : > { %v1472_v10 = vcombine.low %v3238_v6, %v3241_v7  ;;  %v1230_v11 = vpop.f32.mrb[32].mxu0  ;;  %v1303_v14 = vpop.f32.mrb[32].mxu1 }
 0x2d4   : > { %v1231_v15 = vadd.f32 %v1230_v11, %v3201_v39  ;;  %v1304_v17 = vadd.f32 %v1303_v14, %v3206_v58  ;;  %v1232_v18 = vpop.f32.mrb[33].mxu0  ;;  %v1305_v12 = vpop.f32.mrb[33].mxu1 }
 0x2d5   : > { %v1233_v13 = vadd.f32 %v1232_v18, %v3211_v62  ;;  %v1306_v20 = vadd.f32 %v1305_v12, %v3216_v63  ;;  %v1234_v21 = vpop.f32.mrb[34].mxu0  ;;  %v1307_v22 = vpop.f32.mrb[34].mxu1 }
 0x2d6   : > { %v1377_v24 = vmax.f32 %v1376_v54, %v1231_v15  ;;  %v1403_v23 = vmax.f32 %v1402_v3, %v1304_v17  ;;  %v1235_v25 = vadd.f32 %v1234_v21, %v3201_v39  ;;  %v1308_v27 = vadd.f32 %v1307_v22, %v3206_v58  ;;  %v1236_v28 = vpop.f32.mrb[35].mxu0  ;;  %v1309_v29 = vpop.f32.mrb[35].mxu1 }
 0x2d7   : > { %v1390_v31 = vmax.f32 %v1389_v8, %v1233_v13  ;;  %v1416_v32 = vmax.f32 %v1415_v9, %v1306_v20  ;;  %v1237_v33 = vadd.f32 %v1236_v28, %v3211_v62  ;;  %v1310_v34 = vadd.f32 %v1309_v29, %v3216_v63 }
 0x2d8   : > { %v1378_v35 = vmax.f32 %v1377_v24, %v1235_v25  ;;  %v1404_v36 = vmax.f32 %v1403_v23, %v1308_v27 }
 0x2d9   : > { %v1391_v37 = vmax.f32 %v1390_v31, %v1237_v33  ;;  %v1417_v38 = vmax.f32 %v1416_v32, %v1310_v34 }
 0x2db   : > { %v1240_v59 = vpop.f32.mrb[36].mxu0  ;;  %v1313_v40 = vpop.f32.mrb[36].mxu1 }
 0x2dc   : > { %v1241_v41 = vadd.f32 %v1240_v59, %v3201_v39  ;;  %v1314_v42 = vadd.f32 %v1313_v40, %v3206_v58  ;;  %v1242_v43 = vpop.f32.mrb[37].mxu0  ;;  %v1315_v45 = vpop.f32.mrb[37].mxu1 }
 0x2dd   : > { %v1243_v44 = vadd.f32 %v1242_v43, %v3211_v62  ;;  %v1316_v46 = vadd.f32 %v1315_v45, %v3216_v63  ;;  %v1244_v47 = vpop.f32.mrb[38].mxu0  ;;  %v1317_v48 = vpop.f32.mrb[38].mxu1 }
 0x2de   : > { %v1379_v49 = vmax.f32 %v1378_v35, %v1241_v41  ;;  %v1405_v50 = vmax.f32 %v1404_v36, %v1314_v42  ;;  %v1245_v60 = vadd.f32 %v1244_v47, %v3201_v39  ;;  %v1318_v61 = vadd.f32 %v1317_v48, %v3206_v58  ;;  %v1246_v0 = vpop.f32.mrb[39].mxu0  ;;  %v1319_v1 = vpop.f32.mrb[39].mxu1 }
 0x2df   : > { %v1392_v2 = vmax.f32 %v1391_v37, %v1243_v44  ;;  %v1418_v54 = vmax.f32 %v1417_v38, %v1316_v46  ;;  %v1247_v3 = vadd.f32 %v1246_v0, %v3211_v62  ;;  %v1320_v4 = vadd.f32 %v1319_v1, %v3216_v63  ;;  %v2633_v0 = vld [vmem:[%s3407_s7 + $0x1d0] sm:$0xff]  }
 0x2e0   : > { %v1380_v5 = vmax.f32 %v1379_v49, %v1245_v60  ;;  %v1406_v8 = vmax.f32 %v1405_v50, %v1318_v61  ;;  %v1480_v41 = vrot.slane %v1472_v10, %v3227_v30  ;;  %v2630_v50 = vld [vmem:[%s3407_s7 + $0x108] sm:$0xff]   ;;  %v2632_v61 = vld [vmem:[%s3407_s7 + $0x150] sm:$0xff]  }
 0x2e1   : > { %v1393_v9 = vmax.f32 %v1392_v2, %v1247_v3  ;;  %v1419_v11 = vmax.f32 %v1418_v54, %v1320_v4  ;;  %v2631_v60 = vld [vmem:[%s3407_s7 + $0x188] sm:$0xff]   ;;  %v2634_v1 = vld [vmem:[%s3407_s7 + $0x110] sm:$0xff]   ;;  %v2636_v54 = vld [vmem:[%s3407_s7 + $0x158] sm:$0xff]  }
 0x2e2   : > { %v1381_v14 = vrot.slane %v1380_v5, 4  ;;  %v1407_v15 = vrot.slane %v1406_v8, 4  ;;  %v2635_v2 = vld [vmem:[%s3407_s7 + $0x190] sm:$0xff]   ;;  %v2637_v3 = vld [vmem:[%s3407_s7 + $0x1d8] sm:$0xff]  }
 0x2e3   : > { %v1394_v17 = vrot.slane %v1393_v9, 4  ;;  %v1420_v18 = vrot.slane %v1419_v11, 4  ;;  %v2638_v4 = vld [vmem:[%s3407_s7 + $0x118] sm:$0xff]  }
 0x2e4   : > { %v1382_v12 = vmax.f32 %v1380_v5, %v1381_v14  ;;  %v1408_v39 = vmax.f32 %v1406_v8, %v1407_v15  ;;  %v2639_v5 = vld [vmem:[%s3407_s7 + $0x198] sm:$0xff]   ;;  %v2640_v8 = vld [vmem:[%s3407_s7 + $0x160] sm:$0xff]   ;;  %v2644_v15 = vld [vmem:[%s3407_s7 + $0x168] sm:$0xff]  }
 0x2e5   : > { %v1395_v13 = vmax.f32 %v1393_v9, %v1394_v17  ;;  %v1421_v58 = vmax.f32 %v1419_v11, %v1420_v18  ;;  %v2641_v9 = vld [vmem:[%s3407_s7 + $0x1e0] sm:$0xff]   ;;  %v2645_v17 = vld [vmem:[%s3407_s7 + $0x1e8] sm:$0xff]  }
 0x2e6   : > { %v1383_v20 = vrot.slane %v1382_v12, 2  ;;  %v1409_v21 = vrot.slane %v1408_v39, 2  ;;  %v2642_v11 = vld [vmem:[%s3407_s7 + $0x120] sm:$0xff]   ;;  %v2646_v18 = vld [vmem:[%s3407_s7 + $0x128] sm:$0xff]  }
 0x2e7   : > { %v1396_v22 = vrot.slane %v1395_v13, 2  ;;  %v1422_v24 = vrot.slane %v1421_v58, 2  ;;  %v2643_v14 = vld [vmem:[%s3407_s7 + $0x1a0] sm:$0xff]  }
 0x2e8   : > { %v1384_v23 = vmax.f32 %v1382_v12, %v1383_v20  ;;  %v1410_v62 = vmax.f32 %v1408_v39, %v1409_v21  ;;  %v2647_v12 = vld [vmem:[%s3407_s7 + $0x1a8] sm:$0xff]   ;;  %v2648_v39 = vld [vmem:[%s3407_s7 + $0x170] sm:$0xff]   ;;  %v2652_v21 = vld [vmem:[%s3407_s7 + $0x178] sm:$0xff]  }
 0x2e9   : > { %v1397_v25 = vmax.f32 %v1395_v13, %v1396_v22  ;;  %v1423_v63 = vmax.f32 %v1421_v58, %v1422_v24  ;;  %v2649_v13 = vld [vmem:[%s3407_s7 + $0x1f0] sm:$0xff]   ;;  %v2653_v22 = vld [vmem:[%s3407_s7 + $0x1f8] sm:$0xff]  }
 0x2ea   : > { %v1385_v27 = vrot.slane %v1384_v23, 1  ;;  %v1411_v28 = vrot.slane %v1410_v62, 1  ;;  %v2650_v58 = vld [vmem:[%s3407_s7 + $0x130] sm:$0xff]   ;;  %v2654_v24 = vld [vmem:[%s3407_s7 + $0x138] sm:$0xff]  }
 0x2eb   : > { %v1398_v29 = vrot.slane %v1397_v25, 1  ;;  %v1424_v31 = vrot.slane %v1423_v63, 1  ;;  %v2651_v20 = vld [vmem:[%s3407_s7 + $0x1b0] sm:$0xff]  }
 0x2ec   : > { %v1386_v32 = vmax.f32 %v1384_v23, %v1385_v27  ;;  %v1412_v33 = vmax.f32 %v1410_v62, %v1411_v28  ;;  %v2655_v23 = vld [vmem:[%s3407_s7 + $0x1b8] sm:$0xff]  }
 0x2ed   : > { %v1399_v34 = vmax.f32 %v1397_v25, %v1398_v29  ;;  %v1425_v35 = vmax.f32 %v1423_v63, %v1424_v31  ;;  %v1673_v31 = vld [vmem:[%s3408_s8] sm:$0x1] }
 0x2ef   : > { %v1442_v36 = vcombine.low %v1386_v32, %v1399_v34  ;;  %v1443_v37 = vcombine.low %v1412_v33, %v1425_v35 }
 0x2f1   : > { %v1464_v38 = vrot.slane %v1442_v36, %v3227_v30  ;;  %v1471_v59 = vrot.slane %v1443_v37, %v3227_v30 }
 0x2f3   : > { %v1473_v40 = vcombine.low %v1464_v38, %v1471_v59 }
 0x2f5   : > { %v1487_v42 = vrot.slane %v1473_v40, %v3227_v30 }
 0x2f7   : > { %v3268_v43 = vcombine.low %v1480_v41, %v1487_v42 }
 0x2f9   : > { %v1504_v45 = vrot.slane %v3268_v43, %v676_v56  ;;  %v1512_v44 = vrot.slane %v3268_v43, %v684_v57  ;;  %v1500_v46 = vrot.slane %v3268_v43, %v672_v52  ;;  %v1508_v6 = vrot.slane %v3268_v43, %v680_v53  ;;  %v2626_v52 = vld [vmem:[%s3407_s7 + $0x100] sm:$0xff]  }
 0x2fa   : > { %v1520_v30 = vrot.slane %v3268_v43, %v692_v55  ;;  %v1528_v56 = vrot.slane %v3268_v43, %v700_v26  ;;  %v2627_v53 = vld [vmem:[%s3407_s7 + $0x180] sm:$0xff]   ;;  %v2628_v55 = vld [vmem:[%s3407_s7 + $0x148] sm:$0xff]   ;;  %v1516_v62 = vrot.slane %v3268_v43, %v688_v16  ;;  %v1524_v25 = vrot.slane %v3268_v43, %v696_v19 }
 0x2fb   : > { %v1538_v7 = vpack.c.bf16 %v1504_v45, %v1504_v45  ;;  %v1540_v10 = vpack.c.bf16 %v1512_v44, %v1512_v44  ;;  %v1537_v47 = vpack.c.bf16 %v1500_v46, %v1500_v46  ;;  %v1539_v57 = vpack.c.bf16 %v1508_v6, %v1508_v6  ;;  %v2629_v26 = vld [vmem:[%s3407_s7 + $0x1c8] sm:$0xff]  }
 0x2fc   : > { %v1542_v48 = vpack.c.bf16 %v1520_v30, %v1520_v30  ;;  %v1544_v49 = vpack.c.bf16 %v1528_v56, %v1528_v56  ;;  %v1541_v63 = vpack.c.bf16 %v1516_v62, %v1516_v62  ;;  %v1543_v27 = vpack.c.bf16 %v1524_v25, %v1524_v25 }
 0x2fd   : > { %2090 = vmatprep.mubr.bf16.mxu0 %v1538_v7  ;;  %2130 = vmatprep.mubr.bf16.mxu1 %v1540_v10 }
 0x2fe   : > { %2091 = vmatmul.mubr.bf16.vlgmr.msra.gmra.mrb[40].mxu0 %v1537_v47  ;;  %2131 = vmatmul.mubr.bf16.vlgmr.msra.gmra.mrb[40].mxu1 %v1539_v57 }
 0x2ff   : > { %2492 = vmatpush3.bf16.msra.mxu0 %v2626_v52  ;;  %2514 = vmatpush3.bf16.msra.mxu1 %v2627_v53 }
 0x300   : > { %2170 = vmatprep.mubr.bf16.mxu0 %v1542_v48  ;;  %2210 = vmatprep.mubr.bf16.mxu1 %v1544_v49 }
 0x301   : > { %2493 = vmatprep.subr.bf16.mxu0 %v2628_v55  ;;  %2515 = vmatprep.subr.bf16.mxu1 %v2629_v26 }
 0x303   : > { %2494 = vmatpush3.bf16.msra.mxu0 %v2630_v50  ;;  %2516 = vmatpush3.bf16.msra.mxu1 %v2631_v60 }
 0x304   : > { %2495 = vmatprep.subr.bf16.mxu0 %v2632_v61  ;;  %2517 = vmatprep.subr.bf16.mxu1 %v2633_v0 }
 0x307   : > { %2496 = vmatpush3.bf16.msra.mxu0 %v2634_v1  ;;  %2518 = vmatpush3.bf16.msra.mxu1 %v2635_v2 }
 0x308   : > { %2497 = vmatprep.subr.bf16.mxu0 %v2636_v54  ;;  %2519 = vmatprep.subr.bf16.mxu1 %v2637_v3 }
 0x30b   : > { %2498 = vmatpush3.bf16.msra.mxu0 %v2638_v4  ;;  %2520 = vmatpush3.bf16.msra.mxu1 %v2639_v5 }
 0x30c   : > { %2499 = vmatprep.subr.bf16.mxu0 %v2640_v8  ;;  %2521 = vmatprep.subr.bf16.mxu1 %v2641_v9 }
 0x30f   : > { %2500 = vmatpush3.bf16.msra.mxu0 %v2642_v11  ;;  %2522 = vmatpush3.bf16.msra.mxu1 %v2643_v14 }
 0x310   : > { %2501 = vmatprep.subr.bf16.mxu0 %v2644_v15  ;;  %2523 = vmatprep.subr.bf16.mxu1 %v2645_v17 }
 0x313   : > { %2502 = vmatpush3.bf16.msra.mxu0 %v2646_v18  ;;  %2524 = vmatpush3.bf16.msra.mxu1 %v2647_v12 }
 0x314   : > { %2503 = vmatprep.subr.bf16.mxu0 %v2648_v39  ;;  %2525 = vmatprep.subr.bf16.mxu1 %v2649_v13 }
 0x317   : > { %2504 = vmatpush3.bf16.msra.mxu0 %v2650_v58  ;;  %2526 = vmatpush3.bf16.msra.mxu1 %v2651_v20 }
 0x318   : > { %2505 = vmatprep.subr.bf16.mxu0 %v2652_v21  ;;  %2527 = vmatprep.subr.bf16.mxu1 %v2653_v22 }
 0x31b   : > { %2506 = vmatpush3.bf16.msra.mxu0 %v2654_v24  ;;  %2528 = vmatpush3.bf16.msra.mxu1 %v2655_v23 }
 0x31e   : > { %2171 = vmatmul.mubr.bf16.vlgmr.msra.gmra.mrb[44].mxu0 %v1541_v63  ;;  %2211 = vmatmul.mubr.bf16.vlgmr.msra.gmra.mrb[44].mxu1 %v1543_v27 }
 0x3d1   : > { %v2463_v28 = vpop.f32.mrb[40].mxu0  ;;  %v2485_v29 = vpop.f32.mrb[40].mxu1 }
 0x3d2   : > { %v2464_v32 = vpop.f32.mrb[41].mxu0  ;;  %v2486_v33 = vpop.f32.mrb[41].mxu1 }
 0x3d3   : > { %v2465_v34 = vadd.f32 %v2464_v32, %v2463_v28  ;;  %v2487_v16 = vadd.f32 %v2486_v33, %v2485_v29  ;;  %v2466_v35 = vpop.f32.mrb[42].mxu0  ;;  %v2488_v51 = vpop.f32.mrb[42].mxu1 }
 0x3d4   : > { %v2467_v36 = vpop.f32.mrb[43].mxu0  ;;  %v2489_v19 = vpop.f32.mrb[43].mxu1 }
 0x3d5   : > { %v2093_v37 = vadd.f32 %v2465_v34, %v1673_v31 }
 0x3d7   : > { %v2133_v38 = vadd.f32 %v2487_v16, %v2093_v37 }
 0x3f1   : > { %v2507_v59 = vpop.f32.mrb[44].mxu0  ;;  %v2529_v40 = vpop.f32.mrb[44].mxu1 }
 0x3f2   : > { %v2508_v41 = vpop.f32.mrb[45].mxu0  ;;  %v2530_v42 = vpop.f32.mrb[45].mxu1 }
 0x3f3   : > { %v2509_v43 = vadd.f32 %v2508_v41, %v2507_v59  ;;  %v2531_v45 = vadd.f32 %v2530_v42, %v2529_v40  ;;  %v2510_v44 = vpop.f32.mrb[46].mxu0  ;;  %v2532_v46 = vpop.f32.mrb[46].mxu1 }
 0x3f4   : > { %v2511_v6 = vpop.f32.mrb[47].mxu0  ;;  %v2533_v30 = vpop.f32.mrb[47].mxu1 }
 0x3f5   : > { %v2173_v56 = vadd.f32 %v2509_v43, %v2133_v38 }
 0x3f7   : > { %v2213_v7 = vadd.f32 %v2531_v45, %v2173_v56 }
 0x3f9   : > { %v2218_v10 = vmax.f32 %v2213_v7, 0.0 }
 0x3fb   : > { %2220 = vst.msk [vmem:[%s356_s21] sm:$0x1] %vm2219_vm4, %v2218_v10 }
 0x3fc PF: > { %s19_s11 = sadd.s32 1, %s2678_s11   ;;  %s3410_s30 = smov %s2674_s10 }
 0x3fd   : > { %p16_p5 = scmp.ge.s32.totalorder %s19_s11, 4   ;;  %s3411_s10 = smov %s3413_s12 }
 0x3ff   :  { %18 = sbr.rel (!%p16_p5) target bundleno = 2 (0x2), region = 94 }

</bundles_post_ra>
